<compile_context>
chip_gen: v7x
topology: tpu7x:2x2x1
jax: 0.10.0
libtpu: 0.0.40
codegen_flags: <defaults>
</compile_context>

<pallas_src>
import functools
import math

import jax
import jax.numpy as jnp
from jax.experimental import pallas as pl
from jax.experimental.pallas import tpu as pltpu


# ---------------------------------------------------------------------------
# Kernel
# ---------------------------------------------------------------------------
def _dilate_conv_kernel(*refs, seq, kw, dilation, f1, f2, has_skip, fuse_taps):
    if has_skip:
        x_ref, w_ref, b_ref, w2_ref, b2_ref, o_ref = refs
    else:
        x_ref, w_ref, b_ref, o_ref = refs
        w2_ref = b2_ref = None

    tb = x_ref.shape[0]
    m = tb * seq

    # (tb, f1, seq) -> (tb, seq, f1) -> (m, f1): channels on lanes, time*batch on sublanes.
    # The transpose runs on the XLU slot (otherwise only doing the tap rolls).
    x_nfl = x_ref[...]                                              # (tb, f1, seq) f32
    x = jnp.transpose(x_nfl, (0, 2, 1)).reshape(m, f1)              # (m, f1) f32
    x_bf = x.astype(jnp.bfloat16)

    half = (kw - 1) // 2

    # Within-segment time index, built ONCE as an (m, 1) column; per-tap masks broadcast
    # across lanes (no per-tap full-width iota / % seq).
    t = jax.lax.broadcasted_iota(jnp.int32, (tb, seq, 1), 1).reshape(m, 1)

    def tap(shift):
        # result[r] = x[r - shift] within each length-`seq` batch segment, zeros outside
        # (also stops taps leaking across batch boundaries of the flattened M dim).
        if shift == 0:
            return x_bf
        rolled = pltpu.roll(x, shift=shift % m, axis=0)
        cond = (t >= shift) if shift > 0 else (t < seq + shift)
        maskf = cond.astype(jnp.float32)                            # (m, 1), lane-broadcast
        return (rolled * maskf).astype(jnp.bfloat16)

    # Conv tap k reads x[t + (k - half) * dilation]  ==  tap(shift=(half - k) * dilation).
    shifts = [(half - k) * dilation for k in range(kw)]

    if fuse_taps:
        # v6e/v7x: one matmul, K = kw*f1, N = 2*f2 fills the 256-wide MXU N dimension.
        xcat = jnp.concatenate([tap(s) for s in shifts], axis=-1)   # (m, kw*f1) bf16
        y = jnp.dot(xcat, w_ref[...], preferred_element_type=jnp.float32)
    else:
        # v5e: accumulate kw per-tap K = f1 matmuls; avoids the bf16 lane-concat copy.
        y = None
        for k, s in enumerate(shifts):
            part = jnp.dot(tap(s), w_ref[k * f1:(k + 1) * f1, :],
                           preferred_element_type=jnp.float32)
            y = part if y is None else y + part

    y = y + b_ref[...]                                              # (m, 2*f2) f32
    yg = y[:, :f2]                                                  # 128-aligned slices
    yv = y[:, f2:]
    gate = 0.5 * (jnp.tanh(0.5 * yg) + 1.0)                         # == sigmoid(yg), 1 EUP pass
    gated = gate * jnp.tanh(yv)                                     # (m, f2) f32

    if has_skip:
        # f1 != f2 branch: 1x1 conv on x, leaky_relu(0.1), add (dropout p=0 -> identity).
        skip = jnp.dot(x_bf, w2_ref[...],
                       preferred_element_type=jnp.float32) + b2_ref[...]
        skip = jnp.where(skip >= 0, skip, 0.1 * skip)
        out = skip + gated
        out_nfl = jnp.transpose(out.reshape(tb, seq, f2), (0, 2, 1))
    else:
        # f1 == f2 branch: residual added in the native (tb, f2, seq) layout.
        out_nfl = x_nfl + jnp.transpose(gated.reshape(tb, seq, f2), (0, 2, 1))

    o_ref[...] = out_nfl.astype(o_ref.dtype)


# ---------------------------------------------------------------------------
# Wrapper
# ---------------------------------------------------------------------------
def dilate_conv(x_ncl, params, *, kw, dilation, block_batch=None, fuse_taps=None,
                out_dtype=jnp.float32):
    """x_ncl: (N, f1, L) like PyTorch Conv1d input; returns (N, f2, L). No wrapper transposes."""
    n, f1, seq = x_ncl.shape
    f2 = params["b"].shape[-1] // 2
    has_skip = "w2" in params                         # f1 != f2 path

    if fuse_taps is None:
        try:  # v5e MXU is 128-wide in K/N: per-tap matmuls beat the lane-concat there.
            fuse_taps = "v5" not in jax.devices()[0].device_kind.lower()
        except Exception:
            fuse_taps = True

    x = x_ncl.astype(jnp.float32)

    if block_batch is None:
        # Target M = tb*seq around 2K rows (amortise ~0.35 us/step), keep grid >= 2 when
        # possible (both v7x TensorCores busy), and budget the double-buffered f32 x/out
        # blocks well inside the 32 MiB scoped-VMEM default (v7x: 64 MiB physical).
        tb = max(1, min(n, 2048 // max(seq, 1)))
        if n >= 2:
            tb = min(tb, pl.cdiv(n, 2))
        bytes_per_b = (f1 + f2) * seq * 4 * 2          # x + out blocks, double-buffered
        while tb > 1 and tb * bytes_per_b > (16 << 20):
            tb -= 1
    else:
        tb = block_batch

    # Pad the batch up to a multiple of tb (instead of collapsing to tb = 1).
    n_pad = pl.cdiv(n, tb) * tb
    if n_pad != n:
        x = jnp.pad(x, ((0, n_pad - n), (0, 0), (0, 0)))
    grid = (n_pad // tb,)

    kernel = functools.partial(_dilate_conv_kernel, seq=seq, kw=kw, dilation=dilation,
                               f1=f1, f2=f2, has_skip=has_skip, fuse_taps=fuse_taps)

    in_specs = [
        pl.BlockSpec((tb, f1, seq), lambda i: (i, 0, 0)),          # activations (streamed)
        pl.BlockSpec((kw * f1, 2 * f2), lambda i: (0, 0)),         # fused gate|value weight (bf16)
        pl.BlockSpec((1, 2 * f2), lambda i: (0, 0)),               # fused bias (f32)
    ]
    args = [x, params["w"], params["b"]]
    if has_skip:
        in_specs += [pl.BlockSpec((f1, f2), lambda i: (0, 0)),     # 1x1 skip-conv weight (bf16)
                     pl.BlockSpec((1, f2), lambda i: (0, 0))]      # skip-conv bias (f32)
        args += [params["w2"], params["b2"]]

    out = pl.pallas_call(
        kernel,
        out_shape=jax.ShapeDtypeStruct((n_pad, f2, seq), out_dtype),
        grid=grid,
        in_specs=in_specs,
        out_specs=pl.BlockSpec((tb, f2, seq), lambda i: (i, 0, 0)),
        compiler_params=pltpu.CompilerParams(dimension_semantics=("parallel",)),
    )(*args)

    return out[:n] if n_pad != n else out


# ---------------------------------------------------------------------------
# Deterministic params (conv1d init: N(0, sqrt(2/(kw*f1))), bias = 0).
# Conv1 weight kept FUSED (kw*f1, 2*f2): cols [0:f2] gate, [f2:2f2] value
# (matches torch narrow(1, 0, f2) / narrow(1, f2, f2)); stored bf16 once for the MXU.
# ---------------------------------------------------------------------------
def init_params(key, *, kw, f1, f2):
    k1, k2 = jax.random.split(key)
    std = math.sqrt(2.0 / (kw * f1))
    w = jax.random.normal(k1, (kw * f1, 2 * f2), jnp.float32) * std   # row = k*f1 + c_in
    params = {
        "w32": w,
        "w": w.astype(jnp.bfloat16),
        "b": jnp.zeros((1, 2 * f2), jnp.float32),
    }
    if f1 != f2:
        w2 = jax.random.normal(k2, (f1, f2), jnp.float32) * math.sqrt(2.0 / f1)
        params["w232"] = w2
        params["w2"] = w2.astype(jnp.bfloat16)
        params["b2"] = jnp.zeros((1, f2), jnp.float32)
    return params


# ---------------------------------------------------------------------------
# Plain-JAX f32 reference (mirrors the PyTorch forward)
# ---------------------------------------------------------------------------
def dilate_conv_ref(x_ncl, params, *, kw, dilation):
    n, f1, seq = x_ncl.shape
    f2 = params["b"].shape[-1] // 2
    hi = jax.lax.Precision.HIGHEST
    x = jnp.transpose(x_ncl, (0, 2, 1)).astype(jnp.float32)           # (n, seq, f1)
    half = (kw - 1) // 2
    pad = half * dilation
    xpad = jnp.pad(x, ((0, 0), (pad, pad), (0, 0)))
    taps = [xpad[:, k * dilation: k * dilation + seq, :] for k in range(kw)]
    xcat = jnp.concatenate(taps, axis=-1)                              # (n, seq, kw*f1)
    y = jnp.matmul(xcat, params["w32"], precision=hi) + params["b"]
    yg, yv = y[..., :f2], y[..., f2:]
    gated = jax.nn.sigmoid(yg) * jnp.tanh(yv)
    if f1 == f2:
        out = x + gated
    else:
        skip = jnp.matmul(x, params["w232"], precision=hi) + params["b2"]
        skip = jnp.where(skip >= 0, skip, 0.1 * skip)
        out = skip + gated
    return jnp.transpose(out, (0, 2, 1))


if __name__ == "__main__":
    key = jax.random.PRNGKey(0)
    kx1, kx2, kp1, kp2 = jax.random.split(key, 4)

    # Case 1: f1 == f2 (residual branch), dilation 2 — the WaveNet configuration.
    n, f1, f2, seq, kw, dil = 4, 128, 128, 128, 3, 2
    x = jax.random.normal(kx1, (n, f1, seq), jnp.float32)
    params = init_params(kp1, kw=kw, f1=f1, f2=f2)
    out = jax.block_until_ready(dilate_conv(x, params, kw=kw, dilation=dil))
    ref = dilate_conv_ref(x, params, kw=kw, dilation=dil)
    assert out.shape == (n, f2, seq) and out.dtype == jnp.float32
    assert bool(jnp.all(jnp.isfinite(out)))
    assert float(jnp.max(jnp.abs(out - ref))) < 5e-2, "mismatch vs reference (residual path)"

    # Case 2: f1 != f2 (1x1 skip conv + leaky_relu branch), dilation 1, ragged batch
    # (n = 3 exercises the pad-to-multiple-of-tb path).
    n2, f1b, f2b, seq2, dil2 = 3, 128, 256, 128, 1
    x2 = jax.random.normal(kx2, (n2, f1b, seq2), jnp.float32)
    params2 = init_params(kp2, kw=kw, f1=f1b, f2=f2b)
    out2 = jax.block_until_ready(dilate_conv(x2, params2, kw=kw, dilation=dil2))
    ref2 = dilate_conv_ref(x2, params2, kw=kw, dilation=dil2)
    assert out2.shape == (n2, f2b, seq2) and out2.dtype == jnp.float32
    assert bool(jnp.all(jnp.isfinite(out2)))
    assert float(jnp.max(jnp.abs(out2 - ref2))) < 5e-2, "mismatch vs reference (skip path)"

    print("KERNEL_OK")
</pallas_src>

<mosaic_0001>
module attributes {stable_mosaic.version = 11 : i64} {
  func.func @_dilate_conv_kernel(%arg0: i32, %arg1: memref<2x128x128xf32, #tpu.memory_space<vmem>>, %arg2: memref<384x256xbf16, #tpu.memory_space<vmem>>, %arg3: memref<1x256xf32, #tpu.memory_space<vmem>>, %arg4: memref<2x128x128xf32, #tpu.memory_space<vmem>>) attributes {dimension_semantics = [#tpu.dimension_semantics<parallel>], iteration_bounds = array<i64: 2>, scalar_prefetch = 0 : i64, scratch_operands = 0 : i64, tpu.core_type = #tpu.core_type<tc>, window_params = [{transform_indices = @transform_0, window_bounds = array<i64: 2, 128, 128>}, {pipeline_mode = #tpu.pipeline_mode<synchronous>, transform_indices = @transform_1, window_bounds = array<i64: 384, 256>}, {pipeline_mode = #tpu.pipeline_mode<synchronous>, transform_indices = @transform_2, window_bounds = array<i64: 1, 256>}, {transform_indices = @transform_3, window_bounds = array<i64: 2, 128, 128>}]} {
    %c0 = arith.constant 0 : index
    %c0_0 = arith.constant 0 : index
    %c0_1 = arith.constant 0 : index
    %0 = vector.load %arg1[%c0, %c0_0, %c0_1] : memref<2x128x128xf32, #tpu.memory_space<vmem>>, vector<2x128x128xf32>
    %1 = tpu.transpose %0, [0, 2, 1] : vector<2x128x128xf32> -> vector<2x128x128xf32>
    %2 = vector.shape_cast %1 : vector<2x128x128xf32> to vector<256x128xf32>
    %3 = arith.truncf %2 : vector<256x128xf32> to vector<256x128xbf16>
    %4 = tpu.iota {dimensions = array<i32: 1>} : vector<2x128x1xi32>
    %5 = vector.shape_cast %4 : vector<2x128x1xi32> to vector<256x1xi32>
    %c2_i32 = arith.constant 2 : i32
    %6 = tpu.dynamic_rotate %2 by %c2_i32 dim 0 : vector<256x128xf32>, i32 -> vector<256x128xf32>
    %c2_i32_2 = arith.constant 2 : i32
    %7 = vector.broadcast %c2_i32_2 : i32 to vector<256x1xi32>
    %8 = arith.cmpi sge, %5, %7 : vector<256x1xi32>
    %9 = arith.extui %8 : vector<256x1xi1> to vector<256x1xi32>
    %10 = arith.sitofp %9 : vector<256x1xi32> to vector<256x1xf32>
    %11 = vector.broadcast %10 : vector<256x1xf32> to vector<256x128xf32>
    %12 = arith.mulf %6, %11 : vector<256x128xf32>
    %13 = arith.truncf %12 : vector<256x128xf32> to vector<256x128xbf16>
    %c254_i32 = arith.constant 254 : i32
    %14 = tpu.dynamic_rotate %2 by %c254_i32 dim 0 : vector<256x128xf32>, i32 -> vector<256x128xf32>
    %c126_i32 = arith.constant 126 : i32
    %15 = vector.broadcast %c126_i32 : i32 to vector<256x1xi32>
    %16 = arith.cmpi slt, %5, %15 : vector<256x1xi32>
    %17 = arith.extui %16 : vector<256x1xi1> to vector<256x1xi32>
    %18 = arith.sitofp %17 : vector<256x1xi32> to vector<256x1xf32>
    %19 = vector.broadcast %18 : vector<256x1xf32> to vector<256x128xf32>
    %20 = arith.mulf %14, %19 : vector<256x128xf32>
    %21 = arith.truncf %20 : vector<256x128xf32> to vector<256x128xbf16>
    %22 = tpu.concatenate %13, %3, %21 in 1 : vector<256x128xbf16>, vector<256x128xbf16>, vector<256x128xbf16> -> vector<256x384xbf16>
    %c0_3 = arith.constant 0 : index
    %c0_4 = arith.constant 0 : index
    %23 = vector.load %arg2[%c0_3, %c0_4] : memref<384x256xbf16, #tpu.memory_space<vmem>>, vector<384x256xbf16>
    %cst = arith.constant dense<0.000000e+00> : vector<256x256xf32>
    %24 = tpu.matmul %22, %23, %cst {dimension_numbers = #tpu.dot_dimension_numbers<[1], [0], [0], [1], [0, 0, 1, 1], [], []>} : vector<256x384xbf16>, vector<384x256xbf16>, vector<256x256xf32> -> vector<256x256xf32>
    %c0_5 = arith.constant 0 : index
    %c0_6 = arith.constant 0 : index
    %25 = vector.load %arg3[%c0_5, %c0_6] : memref<1x256xf32, #tpu.memory_space<vmem>>, vector<1x256xf32>
    %26 = vector.broadcast %25 : vector<1x256xf32> to vector<256x256xf32>
    %27 = arith.addf %24, %26 : vector<256x256xf32>
    %28 = vector.extract_strided_slice %27 {offsets = [0, 0], sizes = [256, 128], strides = [1, 1]} : vector<256x256xf32> to vector<256x128xf32>
    %29 = vector.extract_strided_slice %27 {offsets = [0, 128], sizes = [256, 128], strides = [1, 1]} : vector<256x256xf32> to vector<256x128xf32>
    %cst_7 = arith.constant 5.000000e-01 : f32
    %30 = vector.broadcast %cst_7 : f32 to vector<256x128xf32>
    %31 = arith.mulf %30, %28 : vector<256x128xf32>
    %32 = math.tanh %31 : vector<256x128xf32>
    %cst_8 = arith.constant 1.000000e+00 : f32
    %33 = vector.broadcast %cst_8 : f32 to vector<256x128xf32>
    %34 = arith.addf %32, %33 : vector<256x128xf32>
    %cst_9 = arith.constant 5.000000e-01 : f32
    %35 = vector.broadcast %cst_9 : f32 to vector<256x128xf32>
    %36 = arith.mulf %35, %34 : vector<256x128xf32>
    %37 = math.tanh %29 : vector<256x128xf32>
    %38 = arith.mulf %36, %37 : vector<256x128xf32>
    %39 = vector.shape_cast %38 : vector<256x128xf32> to vector<2x128x128xf32>
    %40 = tpu.transpose %39, [0, 2, 1] : vector<2x128x128xf32> -> vector<2x128x128xf32>
    %41 = arith.addf %0, %40 : vector<2x128x128xf32>
    %c0_10 = arith.constant 0 : index
    %c0_11 = arith.constant 0 : index
    %c0_12 = arith.constant 0 : index
    %42 = vector.load %arg4[%c0_10, %c0_11, %c0_12] : memref<2x128x128xf32, #tpu.memory_space<vmem>>, vector<2x128x128xf32>
    tpu.vector_store %arg4[%c0_10, %c0_11, %c0_12], %41 {strides = array<i32>} : memref<2x128x128xf32, #tpu.memory_space<vmem>>, vector<2x128x128xf32>,
    return
  }
  func.func @transform_0(%arg0: i32) -> (i32, i32, i32) {
    %c0_i32 = arith.constant 0 : i32
    %c0_i32_0 = arith.constant 0 : i32
    %c0_i32_1 = arith.constant 0 : i32
    return %arg0, %c0_i32, %c0_i32_0 : i32, i32, i32
  }
  func.func @transform_1(%arg0: i32) -> (i32, i32) {
    %c0_i32 = arith.constant 0 : i32
    %c0_i32_0 = arith.constant 0 : i32
    %c0_i32_1 = arith.constant 0 : i32
    return %c0_i32, %c0_i32_0 : i32, i32
  }
  func.func @transform_2(%arg0: i32) -> (i32, i32) {
    %c0_i32 = arith.constant 0 : i32
    %c0_i32_0 = arith.constant 0 : i32
    %c0_i32_1 = arith.constant 0 : i32
    return %c0_i32, %c0_i32_0 : i32, i32
  }
  func.func @transform_3(%arg0: i32) -> (i32, i32, i32) {
    %c0_i32 = arith.constant 0 : i32
    %c0_i32_0 = arith.constant 0 : i32
    %c0_i32_1 = arith.constant 0 : i32
    return %arg0, %c0_i32, %c0_i32_0 : i32, i32, i32
  }
}

</mosaic_0001>

<bundles_post_ra>
// kernel: tpu_custom_call.1
= control target key start
LH: loop header
LB: loop body
LE: loop exit
PB: predicated region body
PF: predicated region fallthrough
CT: control target
= control target key end

     0   :  { %8 = vsyncpa [#allocation3], 0  ;;  %s3468_s0 = inlined_call_operand.hbm [shape: f32[4,128,128], index: 0, kind: input, shape index: {}]   ;;  %s3469_s1 = inlined_call_operand.hbm [shape: bf16[384,256], index: 1, kind: input, shape index: {}]   ;;  %s3470_s2 = inlined_call_operand.vmem [shape: f32[1,256], index: 2, kind: input, shape index: {}]   ;;  %s3471_s3 = inlined_call_operand.hbm [shape: f32[4,128,128], index: 3, kind: output, shape index: {}]  }
   0x1   :  { %10 = vsyncpa [#allocation3 + $0x1], 0 }
   0x2   :  { %11 = vsyncpa [#allocation6], 0 }
   0x3   :  { %12 = vsyncpa [#allocation4], 0 }
   0x4   :  { %14 = vsyncpa [#allocation4 + $0x1], 0  ;;  %s2417_s12 = smov 0   ;;  %s2419_s13 = smov 0  }
   0x5   :  { %s2421_s14 = smov 0   ;;  %s2423_s15 = smov 0  }
   0x6 LB: > { %s2438_s16 = sadd.s32 4294967295, %s2386_s15   ;;  %s1763_s17 = sadd.s32 4294967294, %s2386_s15   ;;  %s2386_s15 = sphi %s2423_s15, %s3573_s15   ;;  %s2382_s14 = sphi %s2421_s14, %s3572_s14   ;;  %s2378_s13 = sphi %s2419_s13, %s3571_s13   ;;  %s2374_s12 = sphi %s2417_s12, %s3570_s12  }
   0x7   : > { %p40_p0 = scmp.ne.s32.totalorder %s2378_s13, %s2374_s12  ;;  %p3472_p1 = scmp.eq.s32.totalorder %s2438_s16, 0 }
   0x8   : > { %p112_p3 = scmp.eq.s32.totalorder %s1763_s17, 1  ;;  %p1764_p5 = scmp.ge.s32.totalorder %s2386_s15, 1 }
   0x9   : > { %p2447_p4 = por %p3472_p1, %p40_p0  ;;  %p119_p7 = scmp.lt.s32.totalorder %s2386_s15, 3 }
   0xa   : > { %p2452_p6 = por %p112_p3, %p40_p0  ;;  %s2388_s21 = smov [#allocation5]  }
   0xb   : > { %s3497_s18 = scalar_select %p2447_p4, 1, 0 }
   0xc   : > { %s3498_s19 = scalar_select %p2452_p6, 1, 0 }
   0xd   : > { %p2457_p8 = pnand %p1764_p5, %p119_p7  ;;  %s131_s22 = sshll.u32 %s2388_s21, 4  ;;  %s2461_s22 = int_to_ptr.vmem [resolvable:$true] %s131_s22 }
   0xe   : > { %s2473_s24 = sadd.s32 1, %s2386_s15   ;;  %s27_s25 = sadd.s32 1, %s2382_s14 }
   0xf   : > { %s3499_s20 = scalar_select %p2457_p8, 1, 0 }
  0x10   : > { %p1971_p9 = pneg %p2457_p8  ;;  %s24_s26 = ssub.s32 %s2386_s15, %s2473_s24 }
  0x11   : > { %s2258_s29 = scalar_lea.hbm %s3469_s1, 6144 }
  0x12   : > { %p2468_p11 = pnand %p1971_p9, %p3472_p1  ;;  %p2259_p12 = scmp.ne.s32.totalorder %s3469_s1, %s2258_s29 }
  0x13   : > { %p2265_p5 = scmp.lt.u32.totalorder %s2258_s29, %s3469_s1 }
  0x14   : > { %p2260_p13 = pneg %p2468_p11 }
  0x16   : > { %p2261_p0 = pnand %p2260_p13, %p2259_p12 }
  0x18   : > { %p2262_p3 = pneg %p2261_p0 }
  0x1a   : > { %p2267_p7 = pnand %p2265_p5, %p2262_p3 }
  0x1c   : > { %2270 = shalt.err (!%p2267_p7)
}
  0x1d   : > { %s2271_s7 = scalar_lea.vmem %s2461_s22, 6144  ;;  %p2279_p2 = scmp.lt.s32.totalorder %s2461_s22, %s2461_s22 }
  0x1e   : > { %p2272_p9 = scmp.ne.s32.totalorder %s2461_s22, %s2271_s7  ;;  %p2280_p6 = scmp.lt.s32.totalorder %s2271_s7, %s2271_s7 }
  0x20   : > { %p2274_p10 = pnand %p2272_p9, %p2260_p13  ;;  %p2281_p4 = por %p2280_p6, %p2279_p2 }
  0x22   : > { %p2275_p1 = pneg %p2274_p10 }
  0x24   : > { %p2282_p8 = pnand %p2281_p4, %p2275_p1 }
  0x26   : > { %2285 = shalt.err (!%p2282_p8)
}
  0x27   : > { %s2389_s8 = smov 128   ;;  %s2390_s9 = smov 8  }
  0x28   : > { %1974 = dma.hbm_to_vmem [thread:$0]  (!%p2468_p11), %s3469_s1, 6144, %s2461_s22, [#allocation6], %s2389_s8, %s2389_s8, %s2390_s9  }
  0x29   : > { %p25_p1 = scmp.eq.s32.totalorder %s24_s26, 0  ;;  %p34_p2 = scmp.ne.s32.totalorder %s2382_s14, %s2378_s13 }
  0x2a   : > { %p35_p4 = scmp.eq.s32.totalorder %s2386_s15, 0  ;;  %p1984_p6 = scmp.lt.s32.totalorder %s2386_s15, 2 }
  0x2b   : > { %s2507_s17 = scalar_select %p25_p1, %s2382_s14, %s27_s25  }
  0x2c   : > { %p36_p8 = por %p35_p4, %p34_p2  ;;  %p3501_p10 = scmp.eq.s32.totalorder %s2438_s16, 1 }
  0x2d   : > { %s148_s23 = sand.u32 1, %s2382_s14   ;;  %s1832_s27 = sshll.u32 %s2386_s15, 12 }
  0x2e   : > { %p2511_p12 = por %p3501_p10, %p34_p2  ;;  %s1767_s28 = sshll.u32 %s148_s23, 8 }
  0x2f   : > { %s2520_s4 = scalar_lea.hbm %s3468_s0, %s1832_s27  ;;  %s152_s22 = scalar_lea.vmem [#allocation2], %s1767_s28 }
  0x30   : > { %s160_s25 = sshll.u32 %s152_s22, 4  ;;  %p2522_p11 = pnand %p1984_p6, %p36_p8  ;;  %s2526_s25 = int_to_ptr.vmem [resolvable:$true] %s160_s25 }
  0x31   : > { %s2528_s5 = scalar_lea.sflag [#allocation3], %s148_s23  ;;  %s2286_s6 = scalar_lea.hbm %s2520_s4, 4096 }
  0x32   : > { %p2287_p13 = scmp.ne.s32.totalorder %s2520_s4, %s2286_s6  ;;  %p2288_p0 = pneg %p2522_p11 }
  0x33   : > { %s2291_s11 = scalar_lea.hbm %s3468_s0, 8192  ;;  %p2292_p7 = scmp.lt.u32.totalorder %s2520_s4, %s3468_s0 }
  0x34   : > { %p2289_p3 = pnand %p2288_p0, %p2287_p13  ;;  %p2293_p9 = scmp.lt.u32.totalorder %s2291_s11, %s2286_s6 }
  0x35   : > { %p2295_p2 = scmp.lt.u32.totalorder %s2286_s6, %s2520_s4 }
  0x36   : > { %p2290_p5 = pneg %p2289_p3  ;;  %p2294_p1 = por %p2293_p9, %p2292_p7 }
  0x38   : > { %p2296_p4 = por %p2295_p2, %p2294_p1 }
  0x3a   : > { %p2297_p6 = pnand %p2296_p4, %p2290_p5 }
  0x3c   : > { %2300 = shalt.err (!%p2297_p6)
}
  0x3d   : > { %s2301_s23 = scalar_lea.vmem %s2526_s25, 4096  ;;  %s2391_s29 = smov [#allocation2]  }
  0x3e   : > { %p2302_p8 = scmp.ne.s32.totalorder %s2526_s25, %s2301_s23  ;;  %s2306_s30 = sshll.u32 %s2391_s29, 4  ;;  %s2307_s30 = int_to_ptr.vmem [resolvable:$false] %s2306_s30 }
  0x3f   : > { %s2308_s22 = scalar_lea.vmem %s2307_s30, 8192  ;;  %p2309_p3 = scmp.lt.s32.totalorder %s2526_s25, %s2307_s30 }
  0x40   : > { %p2304_p10 = pnand %p2302_p8, %p2288_p0  ;;  %p2310_p7 = scmp.lt.s32.totalorder %s2308_s22, %s2301_s23 }
  0x42   : > { %p2305_p13 = pneg %p2304_p10  ;;  %p2311_p9 = por %p2310_p7, %p2309_p3 }
  0x44   : > { %p2312_p1 = pnand %p2311_p9, %p2305_p13 }
  0x46   : > { %2315 = shalt.err (!%p2312_p1)
}
  0x47   : > { %1978 = dma.hbm_to_vmem [thread:$0]  (!%p2522_p11), %s2520_s4, 4096, %s2526_s25, %s2528_s5, %s2389_s8, %s2389_s8, %s2390_s9  }
  0x48   : > { %p3504_p0 = scmp.ne.s32.totalorder %s3499_s20, 0 }
  0x4a   : > { %172 = sbr.rel (%p3504_p0) target bundleno = 790 (0x316), region = 32 }
  0x51   : > { %s2562_s6 = sand.u32 1, %s2378_s13   ;;  %p3505_p5 = scmp.ne.s32.totalorder %s3497_s18, 0 }
  0x52   : > { %s1772_s7 = sshll.u32 %s2562_s6, 8  ;;  %s175_s10 = scalar_lea.sflag [#allocation3], %s2562_s6 }
  0x53   : > { %s2568_s26 = scalar_lea.vmem [#allocation2], %s1772_s7 }
  0x54   : > { %2361 = dma.done.wait (%p3505_p5), %s175_s10, 4096  }
  0x55   : > { %2363 = vsyncadd (%p3505_p5), %s175_s10, 4294963200  ;;  %p3506_p11 = scmp.eq.s32.totalorder %s2438_s16, 0 }
  0x57   : > { %2365 = dma.done.wait (%p3506_p11), [#allocation6], 6144   ;;  %p3507_p2 = pmov %p3506_p11 }
  0x58   : > { %v224_v0 = vld [vmem:[%s2568_s26 + $0x80] sm:$0xff]  ;;  %v225_v2 = vld [vmem:[%s2568_s26 + $0x88] sm:$0xff]  ;;  %v226_v4 = vld [vmem:[%s2568_s26 + $0x90] sm:$0xff]  ;;  %v3478_v13 = vmov 0   ;;  %s3352_s8 = scalar_lea.vmem [#allocation7], %s1772_s7  ;;  %s1834_s9 = sshll.u32 %s2438_s16, 12 }
  0x59   : > { %2367 = vsyncadd (%p3507_p2), [#allocation6], 4294961152  ;;  %v208_v1 = vld [vmem:[%s2568_s26] sm:$0xff]  ;;  %272 = vxpose.xlu0.b32.start [1/16] %v224_v0, 128  ;;  %v209_v3 = vld [vmem:[%s2568_s26 + $0x8] sm:$0xff]  ;;  %1184 = vmatprep.mubr.bf16.mxu0 %v3478_v13  ;;  %s1680_s4 = sshll.u32 %s3352_s8, 4  ;;  %s3420_s11 = scalar_lea.hbm %s3471_s3, %s1834_s9  ;;  %s3422_s4 = int_to_ptr.vmem [resolvable:$true] %s1680_s4 }
  0x5a   : > { %240 = vxpose.xlu1.b32.start [1/16] %v208_v1, 128  ;;  %v210_v5 = vld [vmem:[%s2568_s26 + $0x10] sm:$0xff]  ;;  %v227_v6 = vld [vmem:[%s2568_s26 + $0x98] sm:$0xff]  ;;  %v2026_v8 = vld [vmem:[#allocation5 + $0x104] ss:$8 sps:$4 sm:$0xff]   ;;  %s1666_s27 = scalar_lea.sflag [#allocation4], %s2562_s6  ;;  %s2316_s28 = scalar_lea.vmem %s3422_s4, 4096 }
  0x5b   : > { %v211_v7 = vld [vmem:[%s2568_s26 + $0x18] sm:$0xff]  ;;  %v2028_v9 = vld [vmem:[#allocation5 + $0x100] ss:$8 sps:$4 sm:$0xff]   ;;  %1152 = vmatprep.subr.bf16.mxu0 %v2026_v8  ;;  %v2032_v15 = vld [vmem:[#allocation5 + $0x124] ss:$8 sps:$4 sm:$0xff]   ;;  %p2317_p4 = scmp.ne.s32.totalorder %s3422_s4, %s2316_s28  ;;  %s2394_s16 = smov [#allocation7]  }
  0x5c   : > { %v2029_v10 = vld [vmem:[#allocation5 + $0x114] ss:$8 sps:$4 sm:$0xff]   ;;  %v228_v11 = vld [vmem:[%s2568_s26 + $0xa0] sm:$0xff]  ;;  %1153 = vmatpush1.bf16.msra.mxu0 %v2028_v9  ;;  %v2031_v14 = vld [vmem:[#allocation5 + $0x110] ss:$8 sps:$4 sm:$0xff]   ;;  %s2320_s23 = sshll.u32 %s2394_s16, 4  ;;  %s2321_s23 = int_to_ptr.vmem [resolvable:$false] %s2320_s23 }
  0x5d   : > { %273 = vxpose.xlu0.b32.cont [2/16] %v225_v2, 128  ;;  %v212_v12 = vld [vmem:[%s2568_s26 + $0x20] sm:$0xff]  ;;  %1154 = vmatprep.subr.bf16.mxu0 %v2029_v10  ;;  %v229_v16 = vld [vmem:[%s2568_s26 + $0xa8] sm:$0xff]  ;;  %v230_v21 = vld [vmem:[%s2568_s26 + $0xb0] sm:$0xff]  ;;  %p2318_p6 = pnand %p2317_p4, %p2511_p12  ;;  %s2322_s29 = scalar_lea.vmem %s2321_s23, 8192 }
  0x5e   : > { %241 = vxpose.xlu1.b32.cont [2/16] %v209_v3, 128  ;;  %v213_v17 = vld [vmem:[%s2568_s26 + $0x28] sm:$0xff]  ;;  %v2035_v22 = vld [vmem:[#allocation5 + $0x134] ss:$8 sps:$4 sm:$0xff]   ;;  %v2037_v24 = vld [vmem:[#allocation5 + $0x130] ss:$8 sps:$4 sm:$0xff]   ;;  %p2323_p10 = scmp.lt.s32.totalorder %s3422_s4, %s2321_s23  ;;  %p2324_p13 = scmp.lt.s32.totalorder %s2322_s29, %s2316_s28 }
  0x5f   : > { %v2034_v18 = vld [vmem:[#allocation5 + $0x120] ss:$8 sps:$4 sm:$0xff]   ;;  %v2044_v19 = vld [vmem:[#allocation5 + $0x4] ss:$8 sps:$4 sm:$0xff]   ;;  %v214_v23 = vld [vmem:[%s2568_s26 + $0x30] sm:$0xff]  ;;  %p2319_p8 = pneg %p2318_p6 }
  0x60   : > { %1155 = vmatpush1.bf16.msra.mxu0 %v2031_v14  ;;  %v2046_v20 = vld [vmem:[#allocation5] ss:$8 sps:$4 sm:$0xff]   ;;  %959 = vmatprep.subr.bf16.mxu1 %v2044_v19  ;;  %v2050_v25 = vld [vmem:[#allocation5 + $0x14] ss:$8 sps:$4 sm:$0xff]   ;;  %v2038_v26 = vld [vmem:[#allocation5 + $0x144] ss:$8 sps:$4 sm:$0xff]   ;;  %p2325_p3 = por %p2324_p13, %p2323_p10 }
  0x61   : > { %274 = vxpose.xlu0.b32.cont [3/16] %v226_v4, 128  ;;  %1156 = vmatprep.subr.bf16.mxu0 %v2032_v15  ;;  %v2052_v27 = vld [vmem:[#allocation5 + $0x10] ss:$8 sps:$4 sm:$0xff]   ;;  %v2056_v28 = vld [vmem:[#allocation5 + $0x24] ss:$8 sps:$4 sm:$0xff]   ;;  %v2040_v31 = vld [vmem:[#allocation5 + $0x140] ss:$8 sps:$4 sm:$0xff]  }
  0x62   : > { %242 = vxpose.xlu1.b32.cont [3/16] %v210_v5, 128  ;;  %960 = vmatpush1.bf16.msra.mxu1 %v2046_v20  ;;  %v231_v29 = vld [vmem:[%s2568_s26 + $0xb8] sm:$0xff]  ;;  %v2058_v33 = vld [vmem:[#allocation5 + $0x20] ss:$8 sps:$4 sm:$0xff]   ;;  %v2047_v38 = vld [vmem:[#allocation5 + $0x164] ss:$8 sps:$4 sm:$0xff]   ;;  %p2326_p7 = pnand %p2325_p3, %p2319_p8 }
  0x63   : > { %961 = vmatprep.subr.bf16.mxu1 %v2050_v25  ;;  %v215_v30 = vld [vmem:[%s2568_s26 + $0x38] sm:$0xff]  ;;  %v232_v35 = vld [vmem:[%s2568_s26 + $0xc0] sm:$0xff]  ;;  %v233_v40 = vld [vmem:[%s2568_s26 + $0xc8] sm:$0xff] }
  0x64   : > { %1157 = vmatpush1.bf16.msra.mxu0 %v2034_v18  ;;  %v2041_v32 = vld [vmem:[#allocation5 + $0x154] ss:$8 sps:$4 sm:$0xff]   ;;  %v216_v36 = vld [vmem:[%s2568_s26 + $0x40] sm:$0xff]  ;;  %v2043_v37 = vld [vmem:[#allocation5 + $0x150] ss:$8 sps:$4 sm:$0xff]   ;;  %v320_v18 = vlaneseq }
  0x65   : > { %275 = vxpose.xlu0.b32.cont [4/16] %v227_v6, 128  ;;  %1158 = vmatprep.subr.bf16.mxu0 %v2035_v22  ;;  %v2059_v34 = vld [vmem:[#allocation5 + $0x34] ss:$8 sps:$4 sm:$0xff]   ;;  %v2061_v39 = vld [vmem:[#allocation5 + $0x30] ss:$8 sps:$4 sm:$0xff]   ;;  %v217_v41 = vld [vmem:[%s2568_s26 + $0x48] sm:$0xff] }
  0x66   : > { %243 = vxpose.xlu1.b32.cont [4/16] %v211_v7, 128  ;;  %962 = vmatpush1.bf16.msra.mxu1 %v2052_v27  ;;  %v2062_v42 = vld [vmem:[#allocation5 + $0x44] ss:$8 sps:$4 sm:$0xff]   ;;  %v2049_v43 = vld [vmem:[#allocation5 + $0x160] ss:$8 sps:$4 sm:$0xff]   ;;  %v2053_v44 = vld [vmem:[#allocation5 + $0x174] ss:$8 sps:$4 sm:$0xff]  }
  0x67   : > { %963 = vmatprep.subr.bf16.mxu1 %v2056_v28  ;;  %v2064_v45 = vld [vmem:[#allocation5 + $0x40] ss:$8 sps:$4 sm:$0xff]   ;;  %v2065_v46 = vld [vmem:[#allocation5 + $0x54] ss:$8 sps:$4 sm:$0xff]   ;;  %v2055_v49 = vld [vmem:[#allocation5 + $0x170] ss:$8 sps:$4 sm:$0xff]  }
  0x68   : > { %1159 = vmatpush1.bf16.msra.mxu0 %v2037_v24  ;;  %v234_v47 = vld [vmem:[%s2568_s26 + $0xd0] sm:$0xff]  ;;  %v2068_v51 = vld [vmem:[#allocation5 + $0x64] ss:$8 sps:$4 sm:$0xff]   ;;  %v235_v52 = vld [vmem:[%s2568_s26 + $0xd8] sm:$0xff] }
  0x69   : > { %276 = vxpose.xlu0.b32.cont [5/16] %v228_v11, 128  ;;  %1160 = vmatprep.subr.bf16.mxu0 %v2038_v26  ;;  %v218_v48 = vld [vmem:[%s2568_s26 + $0x50] sm:$0xff]  ;;  %v219_v53 = vld [vmem:[%s2568_s26 + $0x58] sm:$0xff]  ;;  %v2070_v54 = vld [vmem:[#allocation5 + $0x60] ss:$8 sps:$4 sm:$0xff]  }
  0x6a   : > { %244 = vxpose.xlu1.b32.cont [5/16] %v212_v12, 128  ;;  %964 = vmatpush1.bf16.msra.mxu1 %v2058_v33  ;;  %v2067_v50 = vld [vmem:[#allocation5 + $0x50] ss:$8 sps:$4 sm:$0xff]   ;;  %v2071_v55 = vld [vmem:[#allocation5 + $0x74] ss:$8 sps:$4 sm:$0xff]   ;;  %v236_v56 = vld [vmem:[%s2568_s26 + $0xe0] sm:$0xff] }
  0x6b   : > { %965 = vmatprep.subr.bf16.mxu1 %v2059_v34  ;;  %v220_v57 = vld [vmem:[%s2568_s26 + $0x60] sm:$0xff]  ;;  %v2073_v58 = vld [vmem:[#allocation5 + $0x70] ss:$8 sps:$4 sm:$0xff]   ;;  %v237_v60 = vld [vmem:[%s2568_s26 + $0xe8] sm:$0xff] }
  0x6c   : > { %1161 = vmatpush1.bf16.msra.mxu0 %v2040_v31  ;;  %v2074_v59 = vld [vmem:[#allocation5 + $0x84] ss:$8 sps:$4 sm:$0xff]   ;;  %v2076_v62 = vld [vmem:[#allocation5 + $0x80] ss:$8 sps:$4 sm:$0xff]   ;;  %v2077_v63 = vld [vmem:[#allocation5 + $0x94] ss:$8 sps:$4 sm:$0xff]  }
  0x6d   : > { %277 = vxpose.xlu0.b32.cont [6/16] %v229_v16, 128  ;;  %1162 = vmatprep.subr.bf16.mxu0 %v2041_v32  ;;  %v221_v61 = vld [vmem:[%s2568_s26 + $0x68] sm:$0xff]  ;;  %v238_v0 = vld [vmem:[%s2568_s26 + $0xf0] sm:$0xff]  ;;  %v239_v4 = vld [vmem:[%s2568_s26 + $0xf8] sm:$0xff] }
  0x6e   : > { %245 = vxpose.xlu1.b32.cont [6/16] %v213_v17, 128  ;;  %966 = vmatpush1.bf16.msra.mxu1 %v2061_v39  ;;  %v222_v1 = vld [vmem:[%s2568_s26 + $0x70] sm:$0xff]  ;;  %v2080_v3 = vld [vmem:[#allocation5 + $0xa4] ss:$8 sps:$4 sm:$0xff]   ;;  %v223_v5 = vld [vmem:[%s2568_s26 + $0x78] sm:$0xff] }
  0x6f   : > { %967 = vmatprep.subr.bf16.mxu1 %v2062_v42  ;;  %v2079_v2 = vld [vmem:[#allocation5 + $0x90] ss:$8 sps:$4 sm:$0xff]   ;;  %v2082_v6 = vld [vmem:[#allocation5 + $0xa0] ss:$8 sps:$4 sm:$0xff]   ;;  %v2083_v7 = vld [vmem:[#allocation5 + $0xb4] ss:$8 sps:$4 sm:$0xff]  }
  0x70   : > { %1163 = vmatpush1.bf16.msra.mxu0 %v2043_v37  ;;  %v2085_v8 = vld [vmem:[#allocation5 + $0xb0] ss:$8 sps:$4 sm:$0xff]   ;;  %v2086_v9 = vld [vmem:[#allocation5 + $0xc4] ss:$8 sps:$4 sm:$0xff]   ;;  %v2088_v10 = vld [vmem:[#allocation5 + $0xc0] ss:$8 sps:$4 sm:$0xff]  }
  0x71   : > { %278 = vxpose.xlu0.b32.cont [7/16] %v230_v21, 128  ;;  %1164 = vmatprep.subr.bf16.mxu0 %v2047_v38  ;;  %v2089_v11 = vld [vmem:[#allocation5 + $0xd4] ss:$8 sps:$4 sm:$0xff]   ;;  %v2091_v12 = vld [vmem:[#allocation5 + $0xd0] ss:$8 sps:$4 sm:$0xff]   ;;  %v2092_v14 = vld [vmem:[#allocation5 + $0xe4] ss:$8 sps:$4 sm:$0xff]  }
  0x72   : > { %246 = vxpose.xlu1.b32.cont [7/16] %v214_v23, 128  ;;  %968 = vmatpush1.bf16.msra.mxu1 %v2064_v45  ;;  %v2094_v15 = vld [vmem:[#allocation5 + $0xe0] ss:$8 sps:$4 sm:$0xff]   ;;  %v2095_v16 = vld [vmem:[#allocation5 + $0xf4] ss:$8 sps:$4 sm:$0xff]   ;;  %v2097_v17 = vld [vmem:[#allocation5 + $0xf0] ss:$8 sps:$4 sm:$0xff]  }
  0x73   : > { %969 = vmatprep.subr.bf16.mxu1 %v2065_v46  ;;  %v2615_v21 = vshrl.u32 %v320_v18, 7 }
  0x74   : > { %1165 = vmatpush1.bf16.msra.mxu0 %v2049_v43 }
  0x75   : > { %279 = vxpose.xlu0.b32.cont [8/16] %v231_v29, 128  ;;  %1166 = vmatprep.subr.bf16.mxu0 %v2053_v44  ;;  %vm530_vm0 = vcmp.lt.s32.totalorder %v2615_v21, 6  ;;  %vm369_vm1 = vcmp.lt.s32.totalorder %v2615_v21, 2  ;;  %vm402_vm2 = vcmp.ge.s32.totalorder %v2615_v21, 2 }
  0x76   : > { %247 = vxpose.xlu1.b32.cont [8/16] %v215_v30, 128  ;;  %970 = vmatpush1.bf16.msra.mxu1 %v2067_v50 }
  0x77   : > { %971 = vmatprep.subr.bf16.mxu1 %v2068_v51 }
  0x78   : > { %1167 = vmatpush1.bf16.msra.mxu0 %v2055_v49 }
  0x79   : > { %280 = vxpose.xlu0.b32.cont [9/16] %v232_v35, 128 }
  0x7a   : > { %248 = vxpose.xlu1.b32.cont [9/16] %v216_v36, 128  ;;  %972 = vmatpush1.bf16.msra.mxu1 %v2070_v54 }
  0x7b   : > { %973 = vmatprep.subr.bf16.mxu1 %v2071_v55 }
  0x7d   : > { %281 = vxpose.xlu0.b32.cont [10/16] %v233_v40, 128 }
  0x7e   : > { %249 = vxpose.xlu1.b32.cont [10/16] %v217_v41, 128  ;;  %974 = vmatpush1.bf16.msra.mxu1 %v2073_v58 }
  0x7f   : > { %975 = vmatprep.subr.bf16.mxu1 %v2074_v59 }
  0x81   : > { %282 = vxpose.xlu0.b32.cont [11/16] %v234_v47, 128 }
  0x82   : > { %250 = vxpose.xlu1.b32.cont [11/16] %v218_v48, 128  ;;  %976 = vmatpush1.bf16.msra.mxu1 %v2076_v62 }
  0x83   : > { %977 = vmatprep.subr.bf16.mxu1 %v2077_v63 }
  0x85   : > { %283 = vxpose.xlu0.b32.cont [12/16] %v235_v52, 128 }
  0x86   : > { %251 = vxpose.xlu1.b32.cont [12/16] %v219_v53, 128  ;;  %978 = vmatpush1.bf16.msra.mxu1 %v2079_v2 }
  0x87   : > { %979 = vmatprep.subr.bf16.mxu1 %v2080_v3 }
  0x89   : > { %284 = vxpose.xlu0.b32.cont [13/16] %v236_v56, 128 }
  0x8a   : > { %252 = vxpose.xlu1.b32.cont [13/16] %v220_v57, 128  ;;  %980 = vmatpush1.bf16.msra.mxu1 %v2082_v6 }
  0x8b   : > { %981 = vmatprep.subr.bf16.mxu1 %v2083_v7 }
  0x8d   : > { %285 = vxpose.xlu0.b32.cont [14/16] %v237_v60, 128 }
  0x8e   : > { %253 = vxpose.xlu1.b32.cont [14/16] %v221_v61, 128  ;;  %982 = vmatpush1.bf16.msra.mxu1 %v2085_v8 }
  0x8f   : > { %983 = vmatprep.subr.bf16.mxu1 %v2086_v9 }
  0x91   : > { %286 = vxpose.xlu0.b32.cont [15/16] %v238_v0, 128 }
  0x92   : > { %254 = vxpose.xlu1.b32.cont [15/16] %v222_v1, 128  ;;  %984 = vmatpush1.bf16.msra.mxu1 %v2088_v10 }
  0x93   : > { %985 = vmatprep.subr.bf16.mxu1 %v2089_v11 }
  0x95   : > { %287 = vxpose.xlu0.b32.end [16/16] %v239_v4, 128 }
  0x96   : > { %255 = vxpose.xlu1.b32.end [16/16] %v223_v5, 128  ;;  %986 = vmatpush1.bf16.msra.mxu1 %v2091_v12 }
  0x97   : > { %987 = vmatprep.subr.bf16.mxu1 %v2092_v14 }
  0x9a   : > { %988 = vmatpush1.bf16.msra.mxu1 %v2094_v15 }
  0x9b   : > { %989 = vmatprep.subr.bf16.mxu1 %v2095_v16 }
  0x9e   : > { %990 = vmatpush1.bf16.msra.mxu1 %v2097_v17 }
  0xd9   : > { %v2611_v19 = vpop.trf.xlu0 }
  0xda   : > { %v2613_v20 = vpop.trf.xlu1  ;;  %v3475_v22 = vrot.slane %v2611_v19, 6  ;;  %v3476_v23 = vrot.slane %v2611_v19, 2 }
  0xdb   : > { %v3477_v26 = vrot.slane %v2613_v20, 2 }
  0xdd   : > { %v2619_v24 = vpop.trf.xlu0 }
  0xde   : > { %v2621_v25 = vpop.trf.xlu1  ;;  %v354_v28 = vrot.slane %v2619_v24, 6  ;;  %v515_v29 = vrot.slane %v2619_v24, 2 }
  0xdf   : > { %v499_v30 = vrot.slane %v2621_v25, 2  ;;  %v304_v31 = vpack.c.bf16 %v2621_v25, %v2613_v20 }
  0xe0   : > { %v2637_v32 = vsel %vm530_vm0, %v3476_v23, %v515_v29  ;;  %v2643_v33 = vsel %vm369_vm1, %v3475_v22, %v354_v28 }
  0xe1   : > { %v2645_v34 = vpop.trf.xlu0  ;;  %991 = vmatprep.mubr.bf16.mxu1 %v304_v31  ;;  %v561_v39 = vsel %vm530_vm0, %v3477_v26, %v499_v30 }
  0xe2   : > { %v2647_v35 = vpop.trf.xlu1  ;;  %v355_v36 = vrot.slane %v2645_v34, 6  ;;  %v516_v37 = vrot.slane %v2645_v34, 2 }
  0xe3   : > { %v500_v38 = vrot.slane %v2647_v35, 2 }
  0xe4   : > { %v2660_v41 = vsel %vm530_vm0, %v515_v29, %v516_v37  ;;  %v2664_v42 = vsel %vm369_vm1, %v354_v28, %v355_v36 }
  0xe5   : > { %v560_v40 = vsel %vm530_vm0, %v499_v30, %v500_v38  ;;  %v2666_v43 = vpop.trf.xlu0 }
  0xe6   : > { %v2668_v44 = vpop.trf.xlu1  ;;  %v643_v45 = vpack.c.bf16 %v560_v40, %v561_v39  ;;  %v356_v48 = vrot.slane %v2666_v43, 6  ;;  %v517_v49 = vrot.slane %v2666_v43, 2 }
  0xe7   : > { %v501_v50 = vrot.slane %v2668_v44, 2 }
  0xe8   : > { %1185 = vmatmul.mubr.bf16.vlgmr.msra.gmra.mrb[0].mxu0 %v643_v45  ;;  %v2680_v51 = vsel %vm530_vm0, %v516_v37, %v517_v49  ;;  %v2684_v52 = vsel %vm369_vm1, %v355_v36, %v356_v48 }
  0xe9   : > { %1194 = vmatprep.mubr.bf16.mxu0 %v3478_v13  ;;  %v2686_v53 = vpop.trf.xlu0  ;;  %v559_v59 = vsel %vm530_vm0, %v500_v38, %v501_v50 }
  0xea   : > { %v2688_v54 = vpop.trf.xlu1  ;;  %v357_v56 = vrot.slane %v2686_v53, 6  ;;  %v518_v57 = vrot.slane %v2686_v53, 2 }
  0xeb   : > { %v502_v58 = vrot.slane %v2688_v54, 2 }
  0xec   : > { %v2701_v61 = vsel %vm530_vm0, %v517_v49, %v518_v57  ;;  %v2705_v62 = vsel %vm369_vm1, %v356_v48, %v357_v56 }
  0xed   : > { %v558_v60 = vsel %vm530_vm0, %v501_v50, %v502_v58  ;;  %v2707_v63 = vpop.trf.xlu0 }
  0xee   : > { %v2709_v0 = vpop.trf.xlu1  ;;  %v644_v1 = vpack.c.bf16 %v558_v60, %v559_v59  ;;  %v358_v4 = vrot.slane %v2707_v63, 6  ;;  %v519_v5 = vrot.slane %v2707_v63, 2 }
  0xef   : > { %v503_v6 = vrot.slane %v2709_v0, 2 }
  0xf0   : > { %1195 = vmatmul.mubr.bf16.gmra.mrb[4].mxu0 %v644_v1  ;;  %v2721_v7 = vsel %vm530_vm0, %v518_v57, %v519_v5  ;;  %v2725_v8 = vsel %vm369_vm1, %v357_v56, %v358_v4 }
  0xf1   : > { %1204 = vmatprep.mubr.bf16.mxu0 %v3478_v13  ;;  %v2727_v9 = vpop.trf.xlu0  ;;  %v557_v16 = vsel %vm530_vm0, %v502_v58, %v503_v6 }
  0xf2   : > { %3508 = vst [vmem:[#allocation11_spill] sm:$0xff] %v2727_v9  ;;  %v2729_v10 = vpop.trf.xlu1  ;;  %v359_v12 = vrot.slane %v2727_v9, 6  ;;  %v520_v14 = vrot.slane %v2727_v9, 2  ;;  %v3528_v9 = vrot.slane %v2611_v19, 6 }
  0xf3   : > { %v504_v15 = vrot.slane %v2729_v10, 2 }
  0xf4   : > { %v2742_v18 = vsel %vm530_vm0, %v519_v5, %v520_v14  ;;  %v2746_v28 = vsel %vm369_vm1, %v358_v4, %v359_v12 }
  0xf5   : > { %v556_v17 = vsel %vm530_vm0, %v503_v6, %v504_v15  ;;  %3509 = vst [vmem:[#allocation12_spill] sm:$0xff] %v2746_v28  ;;  %v2748_v29 = vpop.trf.xlu0 }
  0xf6   : > { %v2750_v30 = vpop.trf.xlu1  ;;  %v645_v31 = vpack.c.bf16 %v556_v17, %v557_v16  ;;  %v360_v38 = vrot.slane %v2748_v29, 6  ;;  %v521_v39 = vrot.slane %v2748_v29, 2 }
  0xf7   : > { %v505_v40 = vrot.slane %v2750_v30, 2 }
  0xf8   : > { %1205 = vmatmul.mubr.bf16.gmra.mrb[8].mxu0 %v645_v31  ;;  %v2762_v45 = vsel %vm530_vm0, %v520_v14, %v521_v39  ;;  %v2766_v48 = vsel %vm369_vm1, %v359_v12, %v360_v38 }
  0xf9   : > { %1214 = vmatprep.mubr.bf16.mxu0 %v3478_v13  ;;  %3510 = vst [vmem:[#allocation13_spill] sm:$0xff] %v2766_v48  ;;  %v2768_v49 = vpop.trf.xlu0  ;;  %v555_v60 = vsel %vm530_vm0, %v504_v15, %v505_v40 }
  0xfa   : > { %3511 = vst [vmem:[#allocation14_spill] sm:$0xff] %v2768_v49  ;;  %v2770_v50 = vpop.trf.xlu1  ;;  %v361_v57 = vrot.slane %v2768_v49, 6  ;;  %v522_v58 = vrot.slane %v2768_v49, 2  ;;  %v2393_v49 = vmov 0.0  }
  0xfb   : > { %v506_v59 = vrot.slane %v2770_v50, 2 }
  0xfc   : > { %v2783_v4 = vsel %vm530_vm0, %v521_v39, %v522_v58  ;;  %v2787_v5 = vsel %vm369_vm1, %v360_v38, %v361_v57 }
  0xfd   : > { %v554_v1 = vsel %vm530_vm0, %v505_v40, %v506_v59  ;;  %3512 = vst [vmem:[#allocation15_spill] sm:$0xff] %v2787_v5  ;;  %v2789_v6 = vpop.trf.xlu0 }
  0xfe   : > { %3513 = vst [vmem:[#allocation16_spill] sm:$0xff] %v2789_v6  ;;  %v2791_v12 = vpop.trf.xlu1  ;;  %v646_v14 = vpack.c.bf16 %v554_v1, %v555_v60  ;;  %v362_v17 = vrot.slane %v2789_v6, 6  ;;  %v523_v31 = vrot.slane %v2789_v6, 2  ;;  %v1775_v6 = vsel %vm402_vm2, 1.0, %v2393_v49 }
  0xff   : > { %v507_v39 = vrot.slane %v2791_v12, 2 }
 0x100   : > { %1215 = vmatmul.mubr.bf16.gmra.mrb[12].mxu0 %v646_v14  ;;  %v2803_v38 = vsel %vm530_vm0, %v522_v58, %v523_v31  ;;  %v2807_v40 = vsel %vm369_vm1, %v361_v57, %v362_v17 }
 0x101   : > { %1224 = vmatprep.mubr.bf16.mxu0 %v3478_v13  ;;  %3514 = vst [vmem:[#allocation17_spill] sm:$0xff] %v2807_v40  ;;  %v2809_v60 = vpop.trf.xlu0  ;;  %v553_v58 = vsel %vm530_vm0, %v506_v59, %v507_v39 }
 0x102   : > { %3515 = vst [vmem:[#allocation18_spill] sm:$0xff] %v2809_v60  ;;  %v2811_v1 = vpop.trf.xlu1  ;;  %v363_v56 = vrot.slane %v2809_v60, 6  ;;  %v524_v14 = vrot.slane %v2809_v60, 2 }
 0x103   : > { %v508_v37 = vrot.slane %v2811_v1, 2 }
 0x104   : > { %v2824_v11 = vsel %vm530_vm0, %v523_v31, %v524_v14  ;;  %v2828_v3 = vsel %vm369_vm1, %v362_v17, %v363_v56 }
 0x105   : > { %v552_v57 = vsel %vm530_vm0, %v507_v39, %v508_v37  ;;  %3516 = vst [vmem:[#allocation19_spill] sm:$0xff] %v2828_v3  ;;  %v2830_v15 = vpop.trf.xlu0 }
 0x106   : > { %3517 = vst [vmem:[#allocation20_spill] sm:$0xff] %v2830_v15  ;;  %v2832_v55 = vpop.trf.xlu1  ;;  %v647_v47 = vpack.c.bf16 %v552_v57, %v553_v58  ;;  %v364_v39 = vrot.slane %v2830_v15, 6  ;;  %v525_v31 = vrot.slane %v2830_v15, 2 }
 0x107   : > { %v509_v16 = vrot.slane %v2832_v55, 2 }
 0x108   : > { %1225 = vmatmul.mubr.bf16.gmra.mrb[16].mxu0 %v647_v47  ;;  %v2844_v17 = vsel %vm530_vm0, %v524_v14, %v525_v31  ;;  %v2848_v58 = vsel %vm369_vm1, %v363_v56, %v364_v39 }
 0x109   : > { %1234 = vmatprep.mubr.bf16.mxu0 %v3478_v13  ;;  %3518 = vst [vmem:[#allocation21_spill] sm:$0xff] %v2848_v58  ;;  %v2850_v57 = vpop.trf.xlu0  ;;  %v551_v14 = vsel %vm530_vm0, %v508_v37, %v509_v16  ;;  %v336_v58 = vadd.s32 120, %v2615_v21 }
 0x10a   : > { %3519 = vst [vmem:[#allocation22_spill] sm:$0xff] %v2850_v57  ;;  %v2852_v59 = vpop.trf.xlu1  ;;  %v365_v36 = vrot.slane %v2850_v57, 6  ;;  %v526_v47 = vrot.slane %v2850_v57, 2 }
 0x10b   : > { %v510_v2 = vrot.slane %v2852_v59, 2  ;;  %vm578_vm3 = vcmp.lt.s32.totalorder %v336_v58, 126  ;;  %v3527_v58 = vrot.slane %v2611_v19, 2 }
 0x10c   : > { %v2865_v46 = vsel %vm530_vm0, %v525_v31, %v526_v47  ;;  %v2869_v22 = vsel %vm369_vm1, %v364_v39, %v365_v36  ;;  %v3522_v39 = vmov 0  }
 0x10d   : > { %v550_v56 = vsel %vm530_vm0, %v509_v16, %v510_v2  ;;  %3520 = vst [vmem:[#allocation23_spill] sm:$0xff] %v2869_v22  ;;  %v2871_v27 = vpop.trf.xlu0  ;;  %v337_v22 = vrot.slane %v2613_v20, 6 }
 0x10e   : > { %3521 = vst [vmem:[#allocation24_spill] sm:$0xff] %v2871_v27  ;;  %v2873_v23 = vpop.trf.xlu1  ;;  %v648_v26 = vpack.c.bf16 %v550_v56, %v551_v14  ;;  %v366_v16 = vrot.slane %v2871_v27, 6  ;;  %v527_v31 = vrot.slane %v2871_v27, 2 }
 0x10f   : > { %v511_v3 = vrot.slane %v2873_v23, 2 }
 0x110   : > { %1235 = vmatmul.mubr.bf16.gmra.mrb[20].mxu0 %v648_v26  ;;  %v2886_v14 = vsel %vm530_vm0, %v526_v47, %v527_v31  ;;  %v2890_v56 = vsel %vm369_vm1, %v365_v36, %v366_v16 }
 0x111   : > { %1244 = vmatprep.mubr.bf16.mxu0 %v3522_v39  ;;  %3523 = vst [vmem:[#allocation25_spill] sm:$0xff] %v2890_v56  ;;  %v2892_v37 = vpop.trf.xlu0  ;;  %v549_v47 = vsel %vm530_vm0, %v510_v2, %v511_v3  ;;  %v338_v56 = vrot.slane %v2621_v25, 6  ;;  %v1776_v25 = vsel %vm578_vm3, 1.0, %v2393_v49 }
 0x112   : > { %3524 = vst [vmem:[#allocation26_spill] sm:$0xff] %v2892_v37  ;;  %v2894_v13 = vpop.trf.xlu1  ;;  %v367_v26 = vrot.slane %v2892_v37, 6  ;;  %v528_v27 = vrot.slane %v2892_v37, 2 }
 0x113   : > { %v512_v60 = vrot.slane %v2894_v13, 2  ;;  %v400_v49 = vsel %vm369_vm1, %v337_v22, %v338_v56 }
 0x114   : > { %v2908_v15 = vsel %vm530_vm0, %v527_v31, %v528_v27  ;;  %v2912_v57 = vsel %vm369_vm1, %v366_v16, %v367_v26 }
 0x115   : > { %v548_v36 = vsel %vm530_vm0, %v511_v3, %v512_v60  ;;  %v2916_v37 = vpop.trf.xlu0 }
 0x116   : > { %3525 = vst [vmem:[#allocation27_spill] sm:$0xff] %v2916_v37  ;;  %v2918_v2 = vpop.trf.xlu1  ;;  %v649_v5 = vpack.c.bf16 %v548_v36, %v549_v47  ;;  %v368_v40 = vrot.slane %v2916_v37, 6  ;;  %v529_v31 = vrot.slane %v2916_v37, 2  ;;  %v3526_v36 = vrot.slane %v2613_v20, 2 }
 0x117   : > { %v513_v28 = vrot.slane %v2918_v2, 2 }
 0x118   : > { %1245 = vmatmul.mubr.bf16.gmra.mrb[24].mxu0 %v649_v5  ;;  %v401_v48 = vsel %vm369_vm1, %v368_v40, %v337_v22  ;;  %v2932_v47 = vsel %vm530_vm0, %v528_v27, %v529_v31  ;;  %v562_v3 = vsel %vm530_vm0, %v529_v31, %v3526_v36  ;;  %v2940_v16 = vsel %vm369_vm1, %v367_v26, %v368_v40 }
 0x119   : > { %1254 = vmatprep.mubr.bf16.mxu0 %v3522_v39  ;;  %v450_v5 = vmul.f32 %v1775_v6, %v401_v48  ;;  %v546_v37 = vsel %vm530_vm0, %v513_v28, %v3527_v58  ;;  %v547_v27 = vsel %vm530_vm0, %v512_v60, %v513_v28  ;;  %v3529_v31 = vrot.slane %v2918_v2, 6 }
 0x11a   : > { %v626_v20 = vmul.f32 %v1776_v25, %v546_v37  ;;  %v2956_v26 = vmul.f32 %v1776_v25, %v562_v3  ;;  %v497_v36 = vpack.c.bf16 %v2940_v16, %v2912_v57  ;;  %v339_v58 = vrot.slane %v2647_v35, 6 }
 0x11b   : > { %v385_v40 = vsel %vm369_vm1, %v3529_v31, %v3528_v9  ;;  %v482_v22 = vpack.c.bf16 %v400_v49, %v450_v5  ;;  %v305_v28 = vpack.c.bf16 %v2668_v44, %v2647_v35  ;;  %v340_v60 = vrot.slane %v2668_v44, 6 }
 0x11c   : > { %v2958_v48 = vmul.f32 %v1775_v6, %v385_v40  ;;  %v658_v37 = vpack.c.bf16 %v2956_v26, %v2932_v47  ;;  %v650_v9 = vpack.c.bf16 %v626_v20, %v547_v27  ;;  %v399_v25 = vsel %vm369_vm1, %v338_v56, %v339_v58  ;;  %v3549_v47 = vld [vmem:[#allocation14_spill] sm:$0xff]  ;;  %v3552_v26 = vld [vmem:[#allocation15_spill] sm:$0xff] }
 0x11d   : > { %992 = vmatmul.mubr.bf16.vlgmr.msra.gmra.mrb[0].mxu1 %v482_v22  ;;  %v398_v6 = vsel %vm369_vm1, %v339_v58, %v340_v60  ;;  %v341_v44 = vrot.slane %v2688_v54, 6  ;;  %v306_v49 = vpack.c.bf16 %v2709_v0, %v2688_v54  ;;  %v342_v5 = vrot.slane %v2709_v0, 6 }
 0x11e   : > { %v490_v3 = vpack.c.bf16 %v2643_v33, %v2958_v48  ;;  %1001 = vmatprep.mubr.bf16.mxu1 %v305_v28  ;;  %v483_v35 = vpack.c.bf16 %v398_v6, %v399_v25  ;;  %v3530_v27 = vpack.c.bf16 %v2660_v41, %v2637_v32  ;;  %v343_v40 = vrot.slane %v2729_v10, 6  ;;  %v3555_v48 = vld [vmem:[#allocation18_spill] sm:$0xff] }
 0x11f   : > { %v396_v20 = vsel %vm369_vm1, %v341_v44, %v342_v5  ;;  %v397_v56 = vsel %vm369_vm1, %v340_v60, %v341_v44  ;;  %v307_v54 = vpack.c.bf16 %v2750_v30, %v2729_v10  ;;  %v344_v0 = vrot.slane %v2750_v30, 6 }
 0x120   : > { %1255 = vmatmul.mubr.bf16.gmra.mrb[28].mxu0 %v650_v9  ;;  %v484_v31 = vpack.c.bf16 %v396_v20, %v397_v56  ;;  %v3531_v32 = vpack.c.bf16 %v2701_v61, %v2680_v51  ;;  %v395_v22 = vsel %vm369_vm1, %v342_v5, %v343_v40  ;;  %v345_v28 = vrot.slane %v2770_v50, 6 }
 0x121   : > { %1264 = vmatprep.mubr.bf16.mxu0 %v3522_v39  ;;  %v394_v41 = vsel %vm369_vm1, %v343_v40, %v344_v0  ;;  %v308_v10 = vpack.c.bf16 %v2791_v12, %v2770_v50  ;;  %v346_v30 = vrot.slane %v2791_v12, 6  ;;  %v3532_v51 = vpack.c.bf16 %v2742_v18, %v2721_v7 }
 0x122   : > { %v485_v58 = vpack.c.bf16 %v394_v41, %v395_v22  ;;  %v393_v60 = vsel %vm369_vm1, %v344_v0, %v345_v28  ;;  %v347_v6 = vrot.slane %v2811_v1, 6  ;;  %v309_v50 = vpack.c.bf16 %v2832_v55, %v2811_v1  ;;  %v3564_v0 = vld [vmem:[#allocation27_spill] sm:$0xff]  ;;  %v3565_v41 = vld [vmem:[#allocation25_spill] sm:$0xff] }
 0x123   : > { %v392_v61 = vsel %vm369_vm1, %v345_v28, %v346_v30  ;;  %v348_v12 = vrot.slane %v2832_v55, 6  ;;  %v3533_v7 = vpack.c.bf16 %v2783_v4, %v2762_v45  ;;  %v349_v44 = vrot.slane %v2852_v59, 6  ;;  %v3566_v22 = vld [vmem:[#allocation23_spill] sm:$0xff] }
 0x124   : > { %v486_v9 = vpack.c.bf16 %v392_v61, %v393_v60  ;;  %v391_v25 = vsel %vm369_vm1, %v346_v30, %v347_v6  ;;  %v310_v55 = vpack.c.bf16 %v2873_v23, %v2852_v59  ;;  %v350_v1 = vrot.slane %v2873_v23, 6 }
 0x125   : > { %1002 = vmatmul.mubr.bf16.gmra.mrb[4].mxu1 %v483_v35  ;;  %v390_v18 = vsel %vm369_vm1, %v347_v6, %v348_v12  ;;  %v3534_v45 = vpack.c.bf16 %v2824_v11, %v2803_v38  ;;  %v311_v23 = vpack.c.bf16 %v2918_v2, %v2894_v13  ;;  %v3535_v11 = vpack.c.bf16 %v2865_v46, %v2844_v17 }
 0x126   : > { %1011 = vmatprep.mubr.bf16.mxu1 %v306_v49  ;;  %v487_v35 = vpack.c.bf16 %v390_v18, %v391_v25  ;;  %v388_v4 = vsel %vm369_vm1, %v349_v44, %v350_v1  ;;  %v389_v49 = vsel %vm369_vm1, %v348_v12, %v349_v44  ;;  %v3536_v38 = vrot.slane %v2918_v2, 6  ;;  %v3548_v2 = vld [vmem:[#allocation16_spill] sm:$0xff] }
 0x127   : > { %v488_v5 = vpack.c.bf16 %v388_v4, %v389_v49  ;;  %v3538_v46 = vpack.c.bf16 %v2908_v15, %v2886_v14  ;;  %v3539_v17 = vpack.c.bf16 %v2666_v43, %v2645_v34  ;;  %v3542_v33 = vpack.c.bf16 %v2725_v8, %v2705_v62  ;;  %v3543_v15 = vld [vmem:[#allocation11_spill] sm:$0xff]  ;;  %v3545_v43 = vld [vmem:[#allocation13_spill] sm:$0xff] }
 0x128   : > { %1265 = vmatmul.mubr.bf16.gmra.mrb[32].mxu0 %v3530_v27  ;;  %v351_v27 = vrot.slane %v2894_v13, 6  ;;  %v3537_v13 = vpack.c.bf16 %v2619_v24, %v2611_v19  ;;  %v3540_v19 = vpack.c.bf16 %v2684_v52, %v2664_v42  ;;  %v3541_v24 = vpack.c.bf16 %v2707_v63, %v2686_v53  ;;  %v3551_v52 = vld [vmem:[#allocation17_spill] sm:$0xff]  ;;  %v3554_v63 = vld [vmem:[#allocation20_spill] sm:$0xff] }
 0x129   : > { %1274 = vmatprep.mubr.bf16.mxu0 %v3522_v39  ;;  %v3544_v34 = vpack.c.bf16 %v2748_v29, %v3543_v15  ;;  %v3550_v42 = vpack.c.bf16 %v3548_v2, %v3549_v47  ;;  %v3553_v53 = vpack.c.bf16 %v3551_v52, %v3552_v26  ;;  %v3556_v62 = vpack.c.bf16 %v3554_v63, %v3555_v48  ;;  %v3557_v8 = vld [vmem:[#allocation21_spill] sm:$0xff] }
 0x12a   : > { %v386_v59 = vsel %vm369_vm1, %v351_v27, %v3536_v38  ;;  %v387_v20 = vsel %vm369_vm1, %v350_v1, %v351_v27  ;;  %v711_v27 = vsub.s32 0, %v2615_v21 }
 0x12b   : > { %v489_v56 = vpack.c.bf16 %v386_v59, %v387_v20 }
 0x12d   : > { %1012 = vmatmul.mubr.bf16.gmra.mrb[8].mxu1 %v484_v31  ;;  %v3561_v31 = vld [vmem:[#allocation22_spill] sm:$0xff] }
 0x12e   : > { %1021 = vmatprep.mubr.bf16.mxu1 %v307_v54  ;;  %v3563_v54 = vld [vmem:[#allocation26_spill] sm:$0xff] }
 0x130   : > { %1275 = vmatmul.mubr.bf16.gmra.mrb[36].mxu0 %v3531_v32  ;;  %v319_v32 = vpack.c.bf16 %v3564_v0, %v3563_v54 }
 0x131   : > { %1284 = vmatprep.mubr.bf16.mxu0 %v3522_v39 }
 0x135   : > { %1022 = vmatmul.mubr.bf16.gmra.mrb[12].mxu1 %v485_v58  ;;  %v3567_v58 = vpack.c.bf16 %v3565_v41, %v3566_v22 }
 0x136   : > { %1031 = vmatprep.mubr.bf16.mxu1 %v308_v10 }
 0x138   : > { %1285 = vmatmul.mubr.bf16.gmra.mrb[40].mxu0 %v3532_v51 }
 0x139   : > { %1294 = vmatprep.mubr.bf16.mxu0 %v3522_v39 }
 0x13d   : > { %1032 = vmatmul.mubr.bf16.gmra.mrb[16].mxu1 %v486_v9 }
 0x13e   : > { %1041 = vmatprep.mubr.bf16.mxu1 %v309_v50 }
 0x140   : > { %1295 = vmatmul.mubr.bf16.gmra.mrb[44].mxu0 %v3533_v7 }
 0x141   : > { %1304 = vmatprep.mubr.bf16.mxu0 %v3522_v39 }
 0x145   : > { %1042 = vmatmul.mubr.bf16.gmra.mrb[20].mxu1 %v487_v35 }
 0x146   : > { %1051 = vmatprep.mubr.bf16.mxu1 %v310_v55 }
 0x148   : > { %1305 = vmatmul.mubr.bf16.gmra.mrb[48].mxu0 %v3534_v45 }
 0x149   : > { %1314 = vmatprep.mubr.bf16.mxu0 %v3522_v39 }
 0x14d   : > { %1052 = vmatmul.mubr.bf16.gmra.mrb[24].mxu1 %v488_v5 }
 0x14e   : > { %1061 = vmatprep.mubr.bf16.mxu1 %v311_v23  ;;  %v707_v23 = vld [vmem:[%s3470_s2] sm:$0x3] }
 0x150   : > { %1315 = vmatmul.mubr.bf16.gmra.mrb[52].mxu0 %v3535_v11  ;;  %v715_v11 = vsub.s32 1, %v2615_v21 }
 0x151   : > { %1324 = vmatprep.mubr.bf16.mxu0 %v3522_v39 }
 0x155   : > { %1062 = vmatmul.mubr.bf16.gmra.mrb[28].mxu1 %v489_v56  ;;  %v3149_v56 = vrot.slane %v707_v23, %v711_v27 }
 0x156   : > { %1071 = vmatprep.mubr.bf16.mxu1 %v3537_v13 }
 0x158   : > { %1325 = vmatmul.mubr.bf16.gmra.mrb[56].mxu0 %v3538_v46  ;;  %v3153_v46 = vrot.slane %v707_v23, %v715_v11 }
 0x159   : > { %1334 = vmatprep.mubr.bf16.mxu0 %v3522_v39  ;;  %v3546_v39 = vld [vmem:[#allocation12_spill] sm:$0xff] }
 0x15a   : > { %v3547_v14 = vpack.c.bf16 %v3545_v43, %v3546_v39 }
 0x15d   : > { %1072 = vmatmul.mubr.bf16.gmra.mrb[32].mxu1 %v490_v3  ;;  %v3560_v3 = vld [vmem:[#allocation24_spill] sm:$0xff] }
 0x15e   : > { %1081 = vmatprep.mubr.bf16.mxu1 %v3539_v17  ;;  %v3562_v40 = vpack.c.bf16 %v3560_v3, %v3561_v31 }
 0x160   : > { %1335 = vmatmul.mubr.bf16.gmra.mrb[60].mxu0 %v658_v37  ;;  %v3558_v37 = vld [vmem:[#allocation19_spill] sm:$0xff] }
 0x161   : > { %v3559_v29 = vpack.c.bf16 %v3557_v8, %v3558_v37 }
 0x165   : > { %1082 = vmatmul.mubr.bf16.gmra.mrb[36].mxu1 %v3540_v19 }
 0x166   : > { %1091 = vmatprep.mubr.bf16.mxu1 %v3541_v24 }
 0x16d   : > { %1092 = vmatmul.mubr.bf16.gmra.mrb[40].mxu1 %v3542_v33 }
 0x16e   : > { %1101 = vmatprep.mubr.bf16.mxu1 %v3544_v34 }
 0x175   : > { %1102 = vmatmul.mubr.bf16.gmra.mrb[44].mxu1 %v3547_v14 }
 0x176   : > { %1111 = vmatprep.mubr.bf16.mxu1 %v3550_v42 }
 0x17d   : > { %1112 = vmatmul.mubr.bf16.gmra.mrb[48].mxu1 %v3553_v53 }
 0x17e   : > { %1121 = vmatprep.mubr.bf16.mxu1 %v3556_v62 }
 0x185   : > { %1122 = vmatmul.mubr.bf16.gmra.mrb[52].mxu1 %v3559_v29 }
 0x186   : > { %1131 = vmatprep.mubr.bf16.mxu1 %v3562_v40 }
 0x18d   : > { %1132 = vmatmul.mubr.bf16.gmra.mrb[56].mxu1 %v3567_v58 }
 0x18e   : > { %1141 = vmatprep.mubr.bf16.mxu1 %v319_v32 }
 0x195   : > { %1142 = vmatmul.mubr.bf16.gmra.mrb[60].mxu1 %v497_v36 }
 0x1bb   : > { %v1186_v28 = vpop.f32.mrb[0].mxu0 }
 0x1bc   : > { %v1188_v10 = vpop.f32.mrb[1].mxu0 }
 0x1bd   : > { %v1190_v30 = vpop.f32.mrb[2].mxu0 }
 0x1be   : > { %v1192_v51 = vpop.f32.mrb[3].mxu0 }
 0x1c3   : > { %v1196_v61 = vpop.f32.mrb[4].mxu0 }
 0x1c4   : > { %v1198_v60 = vpop.f32.mrb[5].mxu0 }
 0x1c5   : > { %v3102_v9 = vpop.f32.mrb[6].mxu0 }
 0x1c6   : > { %v3104_v6 = vpop.f32.mrb[7].mxu0 }
 0x1cb   : > { %v3106_v50 = vpop.f32.mrb[8].mxu0 }
 0x1cc   : > { %v3108_v12 = vpop.f32.mrb[9].mxu0 }
 0x1cd   : > { %v3110_v7 = vpop.f32.mrb[10].mxu0 }
 0x1ce   : > { %v3112_v18 = vpop.f32.mrb[11].mxu0 }
 0x1d3   : > { %v3114_v57 = vpop.f32.mrb[12].mxu0 }
 0x1d4   : > { %v3116_v16 = vpop.f32.mrb[13].mxu0 }
 0x1d5   : > { %v3118_v36 = vpop.f32.mrb[14].mxu0 }
 0x1d6   : > { %v3120_v25 = vpop.f32.mrb[15].mxu0 }
 0x1db   : > { %v3122_v35 = vpop.f32.mrb[16].mxu0 }
 0x1dc   : > { %v3124_v44 = vpop.f32.mrb[17].mxu0 }
 0x1dd   : > { %v3126_v55 = vpop.f32.mrb[18].mxu0 }
 0x1de   : > { %v3128_v1 = vpop.f32.mrb[19].mxu0 }
 0x1e3   : > { %v3130_v45 = vpop.f32.mrb[20].mxu0 }
 0x1e4   : > { %v3132_v4 = vpop.f32.mrb[21].mxu0 }
 0x1e5   : > { %v3134_v49 = vpop.f32.mrb[22].mxu0 }
 0x1e6   : > { %v3136_v5 = vpop.f32.mrb[23].mxu0 }
 0x1eb   : > { %v3143_v38 = vpop.f32.mrb[24].mxu0 }
 0x1ec   : > { %v3145_v59 = vpop.f32.mrb[25].mxu0 }
 0x1ed   : > { %v3147_v20 = vpop.f32.mrb[26].mxu0 }
 0x1ee   : > { %v3151_v13 = vpop.f32.mrb[27].mxu0 }
 0x1f0   : > { %v993_v17 = vpop.f32.mrb[0].mxu1 }
 0x1f1   : > { %v994_v19 = vadd.f32 %v993_v17, %v3149_v56  ;;  %v995_v24 = vpop.f32.mrb[1].mxu1 }
 0x1f2   : > { %v996_v33 = vadd.f32 %v995_v24, %v3153_v46  ;;  %v997_v15 = vpop.f32.mrb[2].mxu1 }
 0x1f3   : > { %v3157_v21 = vpop.f32.mrb[28].mxu0  ;;  %v1187_v34 = vadd.f32 %v1186_v28, %v994_v19  ;;  %v998_v43 = vadd.f32 %v997_v15, %v3149_v56  ;;  %v999_v39 = vpop.f32.mrb[3].mxu1 }
 0x1f4   : > { %v3160_v14 = vpop.f32.mrb[29].mxu0  ;;  %v1189_v2 = vadd.f32 %v1188_v10, %v996_v33  ;;  %v1000_v47 = vadd.f32 %v999_v39, %v3153_v46 }
 0x1f5   : > { %v3163_v42 = vpop.f32.mrb[30].mxu0  ;;  %v1345_v52 = vmul.f32 0.5, %v1187_v34  ;;  %v1191_v26 = vadd.f32 %v1190_v30, %v998_v43 }
 0x1f6   : > { %v3165_v53 = vpop.f32.mrb[31].mxu0  ;;  %v1193_v63 = vadd.f32 %v1192_v51, %v1000_v47 }
 0x1f7   : > { %2098 = vtanh.f32 %v1345_v52  ;;  %v1346_v48 = vmul.f32 0.5, %v1191_v26 }
 0x1f8   : > { %v1003_v62 = vpop.f32.mrb[4].mxu1 }
 0x1f9   : > { %2100 = vtanh.f32 %v1346_v48  ;;  %v1004_v8 = vadd.f32 %v1003_v62, %v3149_v56  ;;  %v1005_v37 = vpop.f32.mrb[5].mxu1 }
 0x1fa   : > { %v1006_v29 = vadd.f32 %v1005_v37, %v3153_v46  ;;  %v1007_v3 = vpop.f32.mrb[6].mxu1  ;;  %2102 = vtanh.f32 %v1189_v2 }
 0x1fb   : > { %v3169_v31 = vpop.f32.mrb[32].mxu0  ;;  %v1197_v40 = vadd.f32 %v1196_v61, %v1004_v8  ;;  %v1008_v54 = vadd.f32 %v1007_v3, %v3149_v56  ;;  %v1009_v0 = vpop.f32.mrb[7].mxu1  ;;  %2104 = vtanh.f32 %v1193_v63 }
 0x1fc   : > { %v3172_v32 = vpop.f32.mrb[33].mxu0  ;;  %v1199_v41 = vadd.f32 %v1198_v60, %v1006_v29  ;;  %v1010_v22 = vadd.f32 %v1009_v0, %v3153_v46 }
 0x1fd   : > { %v3175_v58 = vpop.f32.mrb[34].mxu0  ;;  %v1347_v28 = vmul.f32 0.5, %v1197_v40  ;;  %v1201_v10 = vadd.f32 %v3102_v9, %v1008_v54 }
 0x1fe   : > { %v3178_v30 = vpop.f32.mrb[35].mxu0  ;;  %v1203_v51 = vadd.f32 %v3104_v6, %v1010_v22 }
 0x1ff   : > { %2106 = vtanh.f32 %v1347_v28  ;;  %v1348_v61 = vmul.f32 0.5, %v1201_v10 }
 0x200   : > { %v1013_v27 = vpop.f32.mrb[8].mxu1 }
 0x201   : > { %v2099_v23 = vpop.eup %2098  ;;  %2108 = vtanh.f32 %v1348_v61  ;;  %v1014_v11 = vadd.f32 %v1013_v27, %v3149_v56  ;;  %v1015_v60 = vpop.f32.mrb[9].mxu1 }
 0x202   : > { %v1016_v17 = vadd.f32 %v1015_v60, %v3153_v46  ;;  %v1017_v19 = vpop.f32.mrb[10].mxu1  ;;  %v1409_v33 = vadd.f32 1.0, %v2099_v23  ;;  %2110 = vtanh.f32 %v1199_v41 }
 0x203   : > { %v3183_v24 = vpop.f32.mrb[36].mxu0  ;;  %v2101_v15 = vpop.eup %2100  ;;  %v1207_v9 = vadd.f32 %v3106_v50, %v1014_v11  ;;  %v1018_v6 = vadd.f32 %v1017_v19, %v3149_v56  ;;  %2112 = vtanh.f32 %v1203_v51 }
 0x204   : > { %v1019_v34 = vpop.f32.mrb[11].mxu1  ;;  %v3187_v43 = vpop.f32.mrb[37].mxu0  ;;  %v1410_v39 = vadd.f32 1.0, %v2101_v15  ;;  %v1209_v2 = vadd.f32 %v3108_v12, %v1016_v17  ;;  %v1441_v26 = vmul.f32 0.5, %v1409_v33 }
 0x205   : > { %v1020_v47 = vadd.f32 %v1019_v34, %v3153_v46  ;;  %v3191_v52 = vpop.f32.mrb[38].mxu0  ;;  %v2103_v63 = vpop.eup %2102  ;;  %v1349_v48 = vmul.f32 0.5, %v1207_v9  ;;  %v1211_v62 = vadd.f32 %v3110_v7, %v1018_v6 }
 0x206   : > { %v3194_v8 = vpop.f32.mrb[39].mxu0  ;;  %v1505_v37 = vmul.f32 %v2103_v63, %v1441_v26  ;;  %v1442_v29 = vmul.f32 0.5, %v1410_v39  ;;  %v2105_v3 = vpop.eup %2104 }
 0x207   : > { %v1213_v50 = vadd.f32 %v3112_v18, %v1020_v47  ;;  %2114 = vtanh.f32 %v1349_v48  ;;  %v1350_v40 = vmul.f32 0.5, %v1211_v62 }
 0x208   : > { %1537 = vxpose.xlu0.b32.start [1/16] %v1505_v37, 128  ;;  %v1023_v12 = vpop.f32.mrb[12].mxu1  ;;  %v1506_v54 = vmul.f32 %v2105_v3, %v1442_v29 }
 0x209   : > { %v2107_v0 = vpop.eup %2106  ;;  %2116 = vtanh.f32 %v1350_v40  ;;  %v1024_v41 = vadd.f32 %v1023_v12, %v3149_v56  ;;  %v1025_v22 = vpop.f32.mrb[13].mxu1 }
 0x20a   : > { %v1411_v28 = vadd.f32 1.0, %v2107_v0  ;;  %v1026_v7 = vadd.f32 %v1025_v22, %v3153_v46  ;;  %v1027_v10 = vpop.f32.mrb[14].mxu1  ;;  %2118 = vtanh.f32 %v1209_v2 }
 0x20b   : > { %v3199_v51 = vpop.f32.mrb[40].mxu0  ;;  %v2109_v18 = vpop.eup %2108  ;;  %v1217_v61 = vadd.f32 %v3114_v57, %v1024_v41  ;;  %v1028_v27 = vadd.f32 %v1027_v10, %v3149_v56  ;;  %2120 = vtanh.f32 %v1213_v50 }
 0x20c   : > { %v1029_v23 = vpop.f32.mrb[15].mxu1  ;;  %v3203_v11 = vpop.f32.mrb[41].mxu0  ;;  %v1412_v60 = vadd.f32 1.0, %v2109_v18  ;;  %v1219_v17 = vadd.f32 %v3116_v16, %v1026_v7  ;;  %1538 = vxpose.xlu0.b32.cont [2/16] %v1506_v54, 128  ;;  %v1443_v15 = vmul.f32 0.5, %v1411_v28 }
 0x20d   : > { %v1030_v19 = vadd.f32 %v1029_v23, %v3153_v46  ;;  %v3207_v33 = vpop.f32.mrb[42].mxu0  ;;  %v2111_v9 = vpop.eup %2110  ;;  %v1351_v6 = vmul.f32 0.5, %v1217_v61  ;;  %v1221_v34 = vadd.f32 %v3118_v36, %v1028_v27 }
 0x20e   : > { %v3210_v57 = vpop.f32.mrb[43].mxu0  ;;  %v1507_v2 = vmul.f32 %v2111_v9, %v1443_v15  ;;  %v1444_v47 = vmul.f32 0.5, %v1412_v60  ;;  %v2113_v26 = vpop.eup %2112 }
 0x20f   : > { %v1223_v39 = vadd.f32 %v3120_v25, %v1030_v19  ;;  %2122 = vtanh.f32 %v1351_v6  ;;  %v1352_v16 = vmul.f32 0.5, %v1221_v34 }
 0x210   : > { %1539 = vxpose.xlu0.b32.cont [3/16] %v1507_v2, 128  ;;  %v1033_v63 = vpop.f32.mrb[16].mxu1  ;;  %v1508_v48 = vmul.f32 %v2113_v26, %v1444_v47 }
 0x211   : > { %v2115_v62 = vpop.eup %2114  ;;  %2124 = vtanh.f32 %v1352_v16  ;;  %v1034_v37 = vadd.f32 %v1033_v63, %v3149_v56  ;;  %v1035_v50 = vpop.f32.mrb[17].mxu1 }
 0x212   : > { %v1413_v29 = vadd.f32 1.0, %v2115_v62  ;;  %v1036_v36 = vadd.f32 %v1035_v50, %v3153_v46  ;;  %v1037_v3 = vpop.f32.mrb[18].mxu1  ;;  %2126 = vtanh.f32 %v1219_v17 }
 0x213   : > { %v3215_v40 = vpop.f32.mrb[44].mxu0  ;;  %v2117_v25 = vpop.eup %2116  ;;  %v1227_v12 = vadd.f32 %v3122_v35, %v1034_v37  ;;  %v1038_v54 = vadd.f32 %v1037_v3, %v3149_v56  ;;  %2128 = vtanh.f32 %v1223_v39 }
 0x214   : > { %v1039_v0 = vpop.f32.mrb[19].mxu1  ;;  %v3219_v41 = vpop.f32.mrb[45].mxu0  ;;  %v1414_v22 = vadd.f32 1.0, %v2117_v25  ;;  %v1229_v28 = vadd.f32 %v3124_v44, %v1036_v36  ;;  %1540 = vxpose.xlu0.b32.cont [4/16] %v1508_v48, 128  ;;  %v1445_v18 = vmul.f32 0.5, %v1413_v29 }
 0x215   : > { %v1040_v7 = vadd.f32 %v1039_v0, %v3153_v46  ;;  %v3223_v10 = vpop.f32.mrb[46].mxu0  ;;  %v2119_v61 = vpop.eup %2118  ;;  %v1353_v27 = vmul.f32 0.5, %v1227_v12  ;;  %v1231_v23 = vadd.f32 %v3126_v55, %v1038_v54 }
 0x216   : > { %v3226_v35 = vpop.f32.mrb[47].mxu0  ;;  %v1509_v17 = vmul.f32 %v2119_v61, %v1445_v18  ;;  %v1446_v19 = vmul.f32 0.5, %v1414_v22  ;;  %v2121_v15 = vpop.eup %2120 }
 0x217   : > { %v1233_v60 = vadd.f32 %v3128_v1, %v1040_v7  ;;  %2130 = vtanh.f32 %v1353_v27  ;;  %v1354_v44 = vmul.f32 0.5, %v1231_v23 }
 0x218   : > { %1541 = vxpose.xlu0.b32.cont [5/16] %v1509_v17, 128  ;;  %v1043_v9 = vpop.f32.mrb[20].mxu1  ;;  %v1510_v6 = vmul.f32 %v2121_v15, %v1446_v19 }
 0x219   : > { %v2123_v34 = vpop.eup %2122  ;;  %2132 = vtanh.f32 %v1354_v44  ;;  %v1044_v2 = vadd.f32 %v1043_v9, %v3149_v56  ;;  %v1045_v39 = vpop.f32.mrb[21].mxu1 }
 0x21a   : > { %v1415_v47 = vadd.f32 1.0, %v2123_v34  ;;  %v1046_v55 = vadd.f32 %v1045_v39, %v3153_v46  ;;  %v1047_v26 = vpop.f32.mrb[22].mxu1  ;;  %2134 = vtanh.f32 %v1229_v28 }
 0x21b   : > { %v3231_v16 = vpop.f32.mrb[48].mxu0  ;;  %v2125_v1 = vpop.eup %2124  ;;  %v1237_v63 = vadd.f32 %v3130_v45, %v1044_v2  ;;  %v1048_v48 = vadd.f32 %v1047_v26, %v3149_v56  ;;  %2136 = vtanh.f32 %v1233_v60 }
 0x21c   : > { %v1049_v62 = vpop.f32.mrb[23].mxu1  ;;  %v3235_v37 = vpop.f32.mrb[49].mxu0  ;;  %v1416_v50 = vadd.f32 1.0, %v2125_v1  ;;  %v1239_v29 = vadd.f32 %v3132_v4, %v1046_v55  ;;  %1542 = vxpose.xlu0.b32.cont [6/16] %v1510_v6, 128  ;;  %v1447_v25 = vmul.f32 0.5, %v1415_v47 }
 0x21d   : > { %v1050_v36 = vadd.f32 %v1049_v62, %v3153_v46  ;;  %v3239_v3 = vpop.f32.mrb[50].mxu0  ;;  %v2127_v12 = vpop.eup %2126  ;;  %v1355_v54 = vmul.f32 0.5, %v1237_v63  ;;  %v1241_v0 = vadd.f32 %v3134_v49, %v1048_v48 }
 0x21e   : > { %v3242_v45 = vpop.f32.mrb[51].mxu0  ;;  %v1511_v28 = vmul.f32 %v2127_v12, %v1447_v25  ;;  %v1448_v7 = vmul.f32 0.5, %v1416_v50  ;;  %v2129_v18 = vpop.eup %2128 }
 0x21f   : > { %v1243_v22 = vadd.f32 %v3136_v5, %v1050_v36  ;;  %2138 = vtanh.f32 %v1355_v54  ;;  %v1356_v4 = vmul.f32 0.5, %v1241_v0 }
 0x220   : > { %1543 = vxpose.xlu0.b32.cont [7/16] %v1511_v28, 128  ;;  %v1053_v61 = vpop.f32.mrb[24].mxu1  ;;  %v1512_v27 = vmul.f32 %v2129_v18, %v1448_v7 }
 0x221   : > { %v2131_v23 = vpop.eup %2130  ;;  %2140 = vtanh.f32 %v1356_v4  ;;  %v1054_v17 = vadd.f32 %v1053_v61, %v3149_v56  ;;  %v1055_v60 = vpop.f32.mrb[25].mxu1 }
 0x222   : > { %v1417_v19 = vadd.f32 1.0, %v2131_v23  ;;  %v1056_v49 = vadd.f32 %v1055_v60, %v3153_v46  ;;  %v1057_v15 = vpop.f32.mrb[26].mxu1  ;;  %2142 = vtanh.f32 %v1239_v29 }
 0x223   : > { %v3247_v44 = vpop.f32.mrb[52].mxu0  ;;  %v2133_v5 = vpop.eup %2132  ;;  %v1247_v9 = vadd.f32 %v3143_v38, %v1054_v17  ;;  %v1058_v6 = vadd.f32 %v1057_v15, %v3149_v56  ;;  %2144 = vtanh.f32 %v1243_v22 }
 0x224   : > { %v1059_v34 = vpop.f32.mrb[27].mxu1  ;;  %v3251_v2 = vpop.f32.mrb[53].mxu0  ;;  %v1418_v39 = vadd.f32 1.0, %v2133_v5  ;;  %v1249_v47 = vadd.f32 %v3145_v59, %v1056_v49  ;;  %1544 = vxpose.xlu0.b32.cont [8/16] %v1512_v27, 128  ;;  %v1449_v1 = vmul.f32 0.5, %v1417_v19 }
 0x225   : > { %v1060_v55 = vadd.f32 %v1059_v34, %v3153_v46  ;;  %v3255_v26 = vpop.f32.mrb[54].mxu0  ;;  %v2135_v63 = vpop.eup %2134  ;;  %v1357_v48 = vmul.f32 0.5, %v1247_v9  ;;  %v1251_v62 = vadd.f32 %v3147_v20, %v1058_v6 }
 0x226   : > { %v3258_v38 = vpop.f32.mrb[55].mxu0  ;;  %v1513_v29 = vmul.f32 %v2135_v63, %v1449_v1  ;;  %v1450_v36 = vmul.f32 0.5, %v1418_v39  ;;  %v2137_v25 = vpop.eup %2136 }
 0x227   : > { %v1253_v50 = vadd.f32 %v3151_v13, %v1060_v55  ;;  %2146 = vtanh.f32 %v1357_v48  ;;  %v1358_v59 = vmul.f32 0.5, %v1251_v62 }
 0x228   : > { %1545 = vxpose.xlu0.b32.cont [9/16] %v1513_v29, 128  ;;  %v1063_v12 = vpop.f32.mrb[28].mxu1  ;;  %v1514_v54 = vmul.f32 %v2137_v25, %v1450_v36 }
 0x229   : > { %v2139_v0 = vpop.eup %2138  ;;  %2148 = vtanh.f32 %v1358_v59  ;;  %v1064_v28 = vadd.f32 %v1063_v12, %v3149_v56  ;;  %v1065_v22 = vpop.f32.mrb[29].mxu1 }
 0x22a   : > { %v1419_v7 = vadd.f32 1.0, %v2139_v0  ;;  %v1066_v20 = vadd.f32 %v1065_v22, %v3153_v46  ;;  %v1067_v18 = vpop.f32.mrb[30].mxu1  ;;  %2150 = vtanh.f32 %v1249_v47 }
 0x22b   : > { %v3263_v4 = vpop.f32.mrb[56].mxu0  ;;  %v2141_v13 = vpop.eup %2140  ;;  %v1257_v61 = vadd.f32 %v3157_v21, %v1064_v28  ;;  %v1068_v27 = vadd.f32 %v1067_v18, %v3149_v56  ;;  %2152 = vtanh.f32 %v1253_v50 }
 0x22c   : > { %v1069_v23 = vpop.f32.mrb[31].mxu1  ;;  %v3267_v17 = vpop.f32.mrb[57].mxu0  ;;  %v1420_v60 = vadd.f32 1.0, %v2141_v13  ;;  %v1259_v19 = vadd.f32 %v3160_v14, %v1066_v20  ;;  %1546 = vxpose.xlu0.b32.cont [10/16] %v1514_v54, 128  ;;  %v1451_v5 = vmul.f32 0.5, %v1419_v7 }
 0x22d   : > { %v1070_v49 = vadd.f32 %v1069_v23, %v3153_v46  ;;  %v3271_v15 = vpop.f32.mrb[58].mxu0  ;;  %v2143_v9 = vpop.eup %2142  ;;  %v1359_v6 = vmul.f32 0.5, %v1257_v61  ;;  %v1261_v34 = vadd.f32 %v3163_v42, %v1068_v27 }
 0x22e   : > { %v3274_v21 = vpop.f32.mrb[59].mxu0  ;;  %v1515_v47 = vmul.f32 %v2143_v9, %v1451_v5  ;;  %v1452_v55 = vmul.f32 0.5, %v1420_v60  ;;  %v2145_v1 = vpop.eup %2144 }
 0x22f   : > { %v1263_v39 = vadd.f32 %v3165_v53, %v1070_v49  ;;  %2154 = vtanh.f32 %v1359_v6  ;;  %v1360_v14 = vmul.f32 0.5, %v1261_v34 }
 0x230   : > { %1547 = vxpose.xlu0.b32.cont [11/16] %v1515_v47, 128  ;;  %v1073_v63 = vpop.f32.mrb[32].mxu1  ;;  %v1516_v48 = vmul.f32 %v2145_v1, %v1452_v55 }
 0x231   : > { %v2147_v62 = vpop.eup %2146  ;;  %2156 = vtanh.f32 %v1360_v14  ;;  %v1074_v29 = vadd.f32 %v1073_v63, %v3149_v56  ;;  %v1075_v50 = vpop.f32.mrb[33].mxu1 }
 0x232   : > { %v1421_v36 = vadd.f32 1.0, %v2147_v62  ;;  %v1076_v42 = vadd.f32 %v1075_v50, %v3153_v46  ;;  %v1077_v25 = vpop.f32.mrb[34].mxu1  ;;  %2158 = vtanh.f32 %v1259_v19 }
 0x233   : > { %v3279_v59 = vpop.f32.mrb[60].mxu0  ;;  %v2149_v53 = vpop.eup %2148  ;;  %v1267_v12 = vadd.f32 %v3169_v31, %v1074_v29  ;;  %v1078_v54 = vadd.f32 %v1077_v25, %v3149_v56  ;;  %2160 = vtanh.f32 %v1263_v39 }
 0x234   : > { %v1079_v0 = vpop.f32.mrb[35].mxu1  ;;  %v3283_v28 = vpop.f32.mrb[61].mxu0  ;;  %v1422_v22 = vadd.f32 1.0, %v2149_v53  ;;  %v1269_v7 = vadd.f32 %v3172_v32, %v1076_v42  ;;  %1548 = vxpose.xlu0.b32.cont [12/16] %v1516_v48, 128  ;;  %v1453_v13 = vmul.f32 0.5, %v1421_v36 }
 0x235   : > { %v1080_v20 = vadd.f32 %v1079_v0, %v3153_v46  ;;  %v3287_v18 = vpop.f32.mrb[62].mxu0  ;;  %v2151_v61 = vpop.eup %2150  ;;  %v1361_v27 = vmul.f32 0.5, %v1267_v12  ;;  %v1271_v23 = vadd.f32 %v3175_v58, %v1078_v54 }
 0x236   : > { %v3290_v31 = vpop.f32.mrb[63].mxu0  ;;  %v1517_v19 = vmul.f32 %v2151_v61, %v1453_v13  ;;  %v1454_v49 = vmul.f32 0.5, %v1422_v22  ;;  %v2153_v5 = vpop.eup %2152 }
 0x237   : > { %v1273_v60 = vadd.f32 %v3178_v30, %v1080_v20  ;;  %2162 = vtanh.f32 %v1361_v27  ;;  %v1362_v32 = vmul.f32 0.5, %v1271_v23 }
 0x238   : > { %1549 = vxpose.xlu0.b32.cont [13/16] %v1517_v19, 128  ;;  %v1083_v9 = vpop.f32.mrb[36].mxu1  ;;  %v1518_v6 = vmul.f32 %v2153_v5, %v1454_v49 }
 0x239   : > { %v2155_v34 = vpop.eup %2154  ;;  %2164 = vtanh.f32 %v1362_v32  ;;  %v1084_v47 = vadd.f32 %v1083_v9, %v3149_v56  ;;  %v1085_v39 = vpop.f32.mrb[37].mxu1 }
 0x23a   : > { %v1423_v55 = vadd.f32 1.0, %v2155_v34  ;;  %v1086_v58 = vadd.f32 %v1085_v39, %v3153_v46  ;;  %v1087_v1 = vpop.f32.mrb[38].mxu1  ;;  %2166 = vtanh.f32 %v1269_v7 }
 0x23b   : > { %v2157_v14 = vpop.eup %2156  ;;  %v1277_v30 = vadd.f32 %v3183_v24, %v1084_v47  ;;  %v1088_v63 = vadd.f32 %v1087_v1, %v3149_v56  ;;  %v1089_v48 = vpop.f32.mrb[39].mxu1  ;;  %2168 = vtanh.f32 %v1273_v60 }
 0x23c   : > { %v1424_v62 = vadd.f32 1.0, %v2157_v14  ;;  %v1279_v29 = vadd.f32 %v3187_v43, %v1086_v58  ;;  %v1090_v50 = vadd.f32 %v1089_v48, %v3153_v46  ;;  %1550 = vxpose.xlu0.b32.cont [14/16] %v1518_v6, 128  ;;  %v1455_v36 = vmul.f32 0.5, %v1423_v55  ;;  %v2159_v42 = vpop.eup %2158 }
 0x23d   : > { %v1363_v25 = vmul.f32 0.5, %v1277_v30  ;;  %v1281_v53 = vadd.f32 %v3191_v52, %v1088_v63  ;;  %v2161_v24 = vpop.eup %2160 }
 0x23e   : > { %v1283_v12 = vadd.f32 %v3194_v8, %v1090_v50  ;;  %v1519_v54 = vmul.f32 %v2159_v42, %v1455_v36  ;;  %v1456_v0 = vmul.f32 0.5, %v1424_v62 }
 0x23f   : > { %2170 = vtanh.f32 %v1363_v25  ;;  %v1364_v22 = vmul.f32 0.5, %v1281_v53 }
 0x240   : > { %v1093_v7 = vpop.f32.mrb[40].mxu1  ;;  %1551 = vxpose.xlu0.b32.cont [15/16] %v1519_v54, 128  ;;  %v1520_v20 = vmul.f32 %v2161_v24, %v1456_v0 }
 0x241   : > { %v2163_v43 = vpop.eup %2162  ;;  %2172 = vtanh.f32 %v1364_v22  ;;  %v1094_v13 = vadd.f32 %v1093_v7, %v3149_v56  ;;  %v1095_v61 = vpop.f32.mrb[41].mxu1 }
 0x242   : > { %v1096_v27 = vadd.f32 %v1095_v61, %v3153_v46  ;;  %v1097_v23 = vpop.f32.mrb[42].mxu1  ;;  %v1425_v60 = vadd.f32 1.0, %v2163_v43  ;;  %2174 = vtanh.f32 %v1279_v29 }
 0x243   : > { %v2165_v52 = vpop.eup %2164  ;;  %v1287_v8 = vadd.f32 %v3199_v51, %v1094_v13  ;;  %v1098_v19 = vadd.f32 %v1097_v23, %v3149_v56  ;;  %v1099_v49 = vpop.f32.mrb[43].mxu1  ;;  %2176 = vtanh.f32 %v1283_v12 }
 0x244   : > { %v1426_v5 = vadd.f32 1.0, %v2165_v52  ;;  %v1289_v32 = vadd.f32 %v3203_v11, %v1096_v27  ;;  %v1100_v9 = vadd.f32 %v1099_v49, %v3153_v46  ;;  %1552 = vxpose.xlu0.b32.end [16/16] %v1520_v20, 128  ;;  %v1457_v6 = vmul.f32 0.5, %v1425_v60  ;;  %v2167_v34 = vpop.eup %2166 }
 0x245   : > { %v1365_v47 = vmul.f32 0.5, %v1287_v8  ;;  %v1291_v39 = vadd.f32 %v3207_v33, %v1098_v19  ;;  %v2169_v51 = vpop.eup %2168 }
 0x246   : > { %v1293_v55 = vadd.f32 %v3210_v57, %v1100_v9  ;;  %v1521_v58 = vmul.f32 %v2167_v34, %v1457_v6  ;;  %v1458_v1 = vmul.f32 0.5, %v1426_v5 }
 0x247   : > { %2178 = vtanh.f32 %v1365_v47  ;;  %v1366_v14 = vmul.f32 0.5, %v1291_v39 }
 0x248   : > { %v1103_v30 = vpop.f32.mrb[44].mxu1  ;;  %1569 = vxpose.xlu1.b32.start [1/16] %v1521_v58, 128  ;;  %v1522_v63 = vmul.f32 %v2169_v51, %v1458_v1 }
 0x249   : > { %v2171_v11 = vpop.eup %2170  ;;  %2180 = vtanh.f32 %v1366_v14  ;;  %v1104_v48 = vadd.f32 %v1103_v30, %v3149_v56  ;;  %v1105_v62 = vpop.f32.mrb[45].mxu1 }
 0x24a   : > { %v1427_v29 = vadd.f32 1.0, %v2171_v11  ;;  %v1106_v50 = vadd.f32 %v1105_v62, %v3153_v46  ;;  %v1107_v36 = vpop.f32.mrb[46].mxu1  ;;  %2182 = vtanh.f32 %v1289_v32 }
 0x24b   : > { %v2173_v33 = vpop.eup %2172  ;;  %v1297_v57 = vadd.f32 %v3215_v40, %v1104_v48  ;;  %v1108_v42 = vadd.f32 %v1107_v36, %v3149_v56  ;;  %v1109_v25 = vpop.f32.mrb[47].mxu1  ;;  %2184 = vtanh.f32 %v1293_v55 }
 0x24c   : > { %v1428_v53 = vadd.f32 1.0, %v2173_v33  ;;  %v1299_v12 = vadd.f32 %v3219_v41, %v1106_v50  ;;  %v1110_v54 = vadd.f32 %v1109_v25, %v3153_v46  ;;  %1570 = vxpose.xlu1.b32.cont [2/16] %v1522_v63, 128  ;;  %v1459_v0 = vmul.f32 0.5, %v1427_v29  ;;  %v2175_v24 = vpop.eup %2174 }
 0x24d   : > { %v1367_v22 = vmul.f32 0.5, %v1297_v57  ;;  %v1301_v7 = vadd.f32 %v3223_v10, %v1108_v42  ;;  %v2177_v40 = vpop.eup %2176 }
 0x24e   : > { %v1303_v20 = vadd.f32 %v3226_v35, %v1110_v54  ;;  %v1523_v43 = vmul.f32 %v2175_v24, %v1459_v0  ;;  %v1460_v13 = vmul.f32 0.5, %v1428_v53 }
 0x24f   : > { %2186 = vtanh.f32 %v1367_v22  ;;  %v1368_v61 = vmul.f32 0.5, %v1301_v7 }
 0x250   : > { %v1113_v27 = vpop.f32.mrb[48].mxu1  ;;  %1571 = vxpose.xlu1.b32.cont [3/16] %v1523_v43, 128  ;;  %v1524_v23 = vmul.f32 %v2177_v40, %v1460_v13 }
 0x251   : > { %v2179_v41 = vpop.eup %2178  ;;  %2188 = vtanh.f32 %v1368_v61  ;;  %v1114_v60 = vadd.f32 %v1113_v27, %v3149_v56  ;;  %v1115_v52 = vpop.f32.mrb[49].mxu1 }
 0x252   : > { %v1429_v8 = vadd.f32 1.0, %v2179_v41  ;;  %v1116_v19 = vadd.f32 %v1115_v52, %v3153_v46  ;;  %v1117_v49 = vpop.f32.mrb[50].mxu1  ;;  %2190 = vtanh.f32 %v1299_v12 }
 0x253   : > { %v2181_v10 = vpop.eup %2180  ;;  %v1307_v35 = vadd.f32 %v3231_v16, %v1114_v60  ;;  %v1118_v5 = vadd.f32 %v1117_v49, %v3149_v56  ;;  %v1119_v32 = vpop.f32.mrb[51].mxu1  ;;  %2192 = vtanh.f32 %v1303_v20 }
 0x254   : > { %v1430_v9 = vadd.f32 1.0, %v2181_v10  ;;  %v1309_v6 = vadd.f32 %v3235_v37, %v1116_v19  ;;  %v1120_v34 = vadd.f32 %v1119_v32, %v3153_v46  ;;  %1572 = vxpose.xlu1.b32.cont [4/16] %v1524_v23, 128  ;;  %v1461_v47 = vmul.f32 0.5, %v1429_v8  ;;  %v2183_v39 = vpop.eup %2182 }
 0x255   : > { %v1369_v55 = vmul.f32 0.5, %v1307_v35  ;;  %v1311_v58 = vadd.f32 %v3239_v3, %v1118_v5  ;;  %v2185_v16 = vpop.eup %2184 }
 0x256   : > { %v1313_v1 = vadd.f32 %v3242_v45, %v1120_v34  ;;  %v1525_v51 = vmul.f32 %v2183_v39, %v1461_v47  ;;  %v1462_v14 = vmul.f32 0.5, %v1430_v9 }
 0x257   : > { %2194 = vtanh.f32 %v1369_v55  ;;  %v1370_v30 = vmul.f32 0.5, %v1311_v58 }
 0x258   : > { %v1123_v63 = vpop.f32.mrb[52].mxu1  ;;  %1573 = vxpose.xlu1.b32.cont [5/16] %v1525_v51, 128  ;;  %v1526_v11 = vmul.f32 %v2185_v16, %v1462_v14 }
 0x259   : > { %v2187_v37 = vpop.eup %2186  ;;  %2196 = vtanh.f32 %v1370_v30  ;;  %v1124_v48 = vadd.f32 %v1123_v63, %v3149_v56  ;;  %v1125_v62 = vpop.f32.mrb[53].mxu1 }
 0x25a   : > { %v1431_v29 = vadd.f32 1.0, %v2187_v37  ;;  %v1126_v50 = vadd.f32 %v1125_v62, %v3153_v46  ;;  %v1127_v36 = vpop.f32.mrb[54].mxu1  ;;  %2198 = vtanh.f32 %v1309_v6 }
 0x25b   : > { %v2189_v3 = vpop.eup %2188  ;;  %v1317_v45 = vadd.f32 %v3247_v44, %v1124_v48  ;;  %v1128_v33 = vadd.f32 %v1127_v36, %v3149_v56  ;;  %v1129_v57 = vpop.f32.mrb[55].mxu1  ;;  %2200 = vtanh.f32 %v1313_v1 }
 0x25c   : > { %v1432_v42 = vadd.f32 1.0, %v2189_v3  ;;  %v1319_v25 = vadd.f32 %v3251_v2, %v1126_v50  ;;  %v1130_v53 = vadd.f32 %v1129_v57, %v3153_v46  ;;  %1574 = vxpose.xlu1.b32.cont [6/16] %v1526_v11, 128  ;;  %v1463_v12 = vmul.f32 0.5, %v1431_v29  ;;  %v2191_v54 = vpop.eup %2190 }
 0x25d   : > { %v1371_v0 = vmul.f32 0.5, %v1317_v45  ;;  %v1321_v24 = vadd.f32 %v3255_v26, %v1128_v33  ;;  %v2193_v44 = vpop.eup %2192 }
 0x25e   : > { %v1323_v22 = vadd.f32 %v3258_v38, %v1130_v53  ;;  %v1527_v7 = vmul.f32 %v2191_v54, %v1463_v12  ;;  %v1464_v20 = vmul.f32 0.5, %v1432_v42 }
 0x25f   : > { %2202 = vtanh.f32 %v1371_v0  ;;  %v1372_v43 = vmul.f32 0.5, %v1321_v24 }
 0x260   : > { %v1133_v13 = vpop.f32.mrb[56].mxu1  ;;  %1575 = vxpose.xlu1.b32.cont [7/16] %v1527_v7, 128  ;;  %v1528_v40 = vmul.f32 %v2193_v44, %v1464_v20 }
 0x261   : > { %v2195_v2 = vpop.eup %2194  ;;  %2204 = vtanh.f32 %v1372_v43  ;;  %v1134_v61 = vadd.f32 %v1133_v13, %v3149_v56  ;;  %v1135_v27 = vpop.f32.mrb[57].mxu1 }
 0x262   : > { %v1433_v23 = vadd.f32 1.0, %v2195_v2  ;;  %v1136_v41 = vadd.f32 %v1135_v27, %v3153_v46  ;;  %v1137_v60 = vpop.f32.mrb[58].mxu1  ;;  %2206 = vtanh.f32 %v1319_v25 }
 0x263   : > { %v2197_v26 = vpop.eup %2196  ;;  %v1327_v38 = vadd.f32 %v3263_v4, %v1134_v61  ;;  %v1138_v52 = vadd.f32 %v1137_v60, %v3149_v56  ;;  %v1139_v8 = vpop.f32.mrb[59].mxu1  ;;  %2208 = vtanh.f32 %v1323_v22 }
 0x264   : > { %v1434_v19 = vadd.f32 1.0, %v2197_v26  ;;  %v1329_v49 = vadd.f32 %v3267_v17, %v1136_v41  ;;  %v1140_v10 = vadd.f32 %v1139_v8, %v3153_v46  ;;  %1576 = vxpose.xlu1.b32.cont [8/16] %v1528_v40, 128  ;;  %v1465_v35 = vmul.f32 0.5, %v1433_v23  ;;  %v2199_v5 = vpop.eup %2198  ;;  %v2226_v41 = vld [vmem:[%s2568_s26] sm:$0xff] }
 0x265   : > { %v1373_v32 = vmul.f32 0.5, %v1327_v38  ;;  %v1331_v9 = vadd.f32 %v3271_v15, %v1138_v52  ;;  %v2201_v4 = vpop.eup %2200  ;;  %v2227_v38 = vld [vmem:[%s2568_s26 + $0x8] sm:$0xff] }
 0x266   : > { %v1333_v6 = vadd.f32 %v3274_v21, %v1140_v10  ;;  %v1529_v34 = vmul.f32 %v2199_v5, %v1465_v35  ;;  %v1466_v47 = vmul.f32 0.5, %v1434_v19  ;;  %v2228_v19 = vld [vmem:[%s2568_s26 + $0x10] sm:$0xff]  ;;  %v2229_v35 = vld [vmem:[%s2568_s26 + $0x18] sm:$0xff] }
 0x267   : > { %2210 = vtanh.f32 %v1373_v32  ;;  %v1374_v39 = vmul.f32 0.5, %v1331_v9  ;;  %v2230_v9 = vld [vmem:[%s2568_s26 + $0x20] sm:$0xff] }
 0x268   : > { %v1143_v55 = vpop.f32.mrb[60].mxu1  ;;  %1577 = vxpose.xlu1.b32.cont [9/16] %v1529_v34, 128  ;;  %v1530_v58 = vmul.f32 %v2201_v4, %v1466_v47  ;;  %v2231_v47 = vld [vmem:[%s2568_s26 + $0x28] sm:$0xff] }
 0x269   : > { %v2203_v17 = vpop.eup %2202  ;;  %2212 = vtanh.f32 %v1374_v39  ;;  %v1144_v1 = vadd.f32 %v1143_v55, %v3149_v56  ;;  %v1145_v51 = vpop.f32.mrb[61].mxu1  ;;  %v2232_v55 = vld [vmem:[%s2568_s26 + $0x30] sm:$0xff] }
 0x26a   : > { %v1435_v14 = vadd.f32 1.0, %v2203_v17  ;;  %v1146_v16 = vadd.f32 %v1145_v51, %v3153_v46  ;;  %v1147_v30 = vpop.f32.mrb[62].mxu1  ;;  %2214 = vtanh.f32 %v1329_v49 }
 0x26b   : > { %v2205_v15 = vpop.eup %2204  ;;  %v1337_v21 = vadd.f32 %v3279_v59, %v1144_v1  ;;  %v1148_v63 = vadd.f32 %v1147_v30, %v3149_v56  ;;  %v1149_v11 = vpop.f32.mrb[63].mxu1  ;;  %2216 = vtanh.f32 %v1333_v6  ;;  %v2233_v1 = vld [vmem:[%s2568_s26 + $0x38] sm:$0xff] }
 0x26c   : > { %v1436_v37 = vadd.f32 1.0, %v2205_v15  ;;  %v1339_v48 = vadd.f32 %v3283_v28, %v1146_v16  ;;  %v1150_v62 = vadd.f32 %v1149_v11, %v3153_v46  ;;  %1578 = vxpose.xlu1.b32.cont [10/16] %v1530_v58, 128  ;;  %v1467_v29 = vmul.f32 0.5, %v1435_v14  ;;  %v2207_v50 = vpop.eup %2206  ;;  %v2234_v16 = vld [vmem:[%s2568_s26 + $0x40] sm:$0xff] }
 0x26d   : > { %v1375_v36 = vmul.f32 0.5, %v1337_v21  ;;  %v1341_v3 = vadd.f32 %v3287_v18, %v1148_v63  ;;  %v2209_v59 = vpop.eup %2208  ;;  %v2235_v21 = vld [vmem:[%s2568_s26 + $0x48] sm:$0xff] }
 0x26e   : > { %v1343_v45 = vadd.f32 %v3290_v31, %v1150_v62  ;;  %v1531_v33 = vmul.f32 %v2207_v50, %v1467_v29  ;;  %v1468_v57 = vmul.f32 0.5, %v1436_v37  ;;  %v2236_v37 = vld [vmem:[%s2568_s26 + $0x50] sm:$0xff]  ;;  %v2237_v29 = vld [vmem:[%s2568_s26 + $0x58] sm:$0xff] }
 0x26f   : > { %2218 = vtanh.f32 %v1375_v36  ;;  %v1376_v56 = vmul.f32 0.5, %v1341_v3  ;;  %v2238_v3 = vld [vmem:[%s2568_s26 + $0x60] sm:$0xff] }
 0x270   : > { %1579 = vxpose.xlu1.b32.cont [11/16] %v1531_v33, 128  ;;  %v1532_v42 = vmul.f32 %v2209_v59, %v1468_v57  ;;  %v2239_v57 = vld [vmem:[%s2568_s26 + $0x68] sm:$0xff] }
 0x271   : > { %v2211_v25 = vpop.eup %2210  ;;  %2220 = vtanh.f32 %v1376_v56 }
 0x272   : > { %v1437_v28 = vadd.f32 1.0, %v2211_v25  ;;  %2222 = vtanh.f32 %v1339_v48 }
 0x273   : > { %v2213_v46 = vpop.eup %2212  ;;  %2224 = vtanh.f32 %v1343_v45 }
 0x274   : > { %v1438_v53 = vadd.f32 1.0, %v2213_v46  ;;  %1580 = vxpose.xlu1.b32.cont [12/16] %v1532_v42, 128  ;;  %v1469_v12 = vmul.f32 0.5, %v1437_v28  ;;  %v2215_v54 = vpop.eup %2214  ;;  %v2240_v42 = vld [vmem:[%s2568_s26 + $0x70] sm:$0xff]  ;;  %v2241_v46 = vld [vmem:[%s2568_s26 + $0x78] sm:$0xff] }
 0x275   : > { %v2217_v31 = vpop.eup %2216 }
 0x276   : > { %v1533_v18 = vmul.f32 %v2215_v54, %v1469_v12  ;;  %v1470_v0 = vmul.f32 0.5, %v1438_v53  ;;  %v2242_v54 = vld [vmem:[%s2568_s26 + $0x80] sm:$0xff] }
 0x278   : > { %1581 = vxpose.xlu1.b32.cont [13/16] %v1533_v18, 128  ;;  %v1534_v24 = vmul.f32 %v2217_v31, %v1470_v0  ;;  %v2243_v31 = vld [vmem:[%s2568_s26 + $0x88] sm:$0xff] }
 0x279   : > { %v2219_v22 = vpop.eup %2218 }
 0x27a   : > { %v1439_v7 = vadd.f32 1.0, %v2219_v22 }
 0x27b   : > { %v2221_v20 = vpop.eup %2220 }
 0x27c   : > { %v1440_v44 = vadd.f32 1.0, %v2221_v20  ;;  %1582 = vxpose.xlu1.b32.cont [14/16] %v1534_v24, 128  ;;  %v1471_v43 = vmul.f32 0.5, %v1439_v7  ;;  %v2223_v13 = vpop.eup %2222  ;;  %v2244_v7 = vld [vmem:[%s2568_s26 + $0x90] sm:$0xff] }
 0x27d   : > { %v2225_v61 = vpop.eup %2224 }
 0x27e   : > { %v1535_v40 = vmul.f32 %v2223_v13, %v1471_v43  ;;  %v1472_v2 = vmul.f32 0.5, %v1440_v44  ;;  %v2245_v43 = vld [vmem:[%s2568_s26 + $0x98] sm:$0xff] }
 0x280   : > { %1583 = vxpose.xlu1.b32.cont [15/16] %v1535_v40, 128  ;;  %v1536_v27 = vmul.f32 %v2225_v61, %v1472_v2  ;;  %v2246_v2 = vld [vmem:[%s2568_s26 + $0xa0] sm:$0xff] }
 0x284   : > { %1584 = vxpose.xlu1.b32.end [16/16] %v1536_v27, 128 }
 0x288   : > { %v1553_v23 = vpop.trf.xlu0 }
 0x289   : > { %v1601_v60 = vadd.f32 %v2226_v41, %v1553_v23  ;;  %v2247_v23 = vld [vmem:[%s2568_s26 + $0xa8] sm:$0xff] }
 0x28b   : > { %1633 = vst [vmem:[%s3352_s8] sm:$0xff] %v1601_v60 }
 0x28c   : > { %v1554_v26 = vpop.trf.xlu0 }
 0x28d   : > { %v1602_v52 = vadd.f32 %v2227_v38, %v1554_v26  ;;  %v2248_v26 = vld [vmem:[%s2568_s26 + $0xb0] sm:$0xff] }
 0x28f   : > { %1634 = vst [vmem:[%s3352_s8 + $0x8] sm:$0xff] %v1602_v52 }
 0x290   : > { %v1555_v8 = vpop.trf.xlu0 }
 0x291   : > { %v1603_v49 = vadd.f32 %v2228_v19, %v1555_v8  ;;  %v2249_v8 = vld [vmem:[%s2568_s26 + $0xb8] sm:$0xff] }
 0x293   : > { %1635 = vst [vmem:[%s3352_s8 + $0x10] sm:$0xff] %v1603_v49 }
 0x294   : > { %v1556_v10 = vpop.trf.xlu0 }
 0x295   : > { %v1604_v5 = vadd.f32 %v2229_v35, %v1556_v10  ;;  %v2250_v10 = vld [vmem:[%s2568_s26 + $0xc0] sm:$0xff] }
 0x297   : > { %1636 = vst [vmem:[%s3352_s8 + $0x18] sm:$0xff] %v1604_v5 }
 0x298   : > { %v1557_v32 = vpop.trf.xlu0 }
 0x299   : > { %v1605_v6 = vadd.f32 %v2230_v9, %v1557_v32  ;;  %v2251_v32 = vld [vmem:[%s2568_s26 + $0xc8] sm:$0xff] }
 0x29b   : > { %1637 = vst [vmem:[%s3352_s8 + $0x20] sm:$0xff] %v1605_v6 }
 0x29c   : > { %v1558_v34 = vpop.trf.xlu0 }
 0x29d   : > { %v1606_v4 = vadd.f32 %v2231_v47, %v1558_v34  ;;  %v2252_v34 = vld [vmem:[%s2568_s26 + $0xd0] sm:$0xff] }
 0x29f   : > { %1638 = vst [vmem:[%s3352_s8 + $0x28] sm:$0xff] %v1606_v4 }
 0x2a0   : > { %v1559_v39 = vpop.trf.xlu0 }
 0x2a1   : > { %v1607_v58 = vadd.f32 %v2232_v55, %v1559_v39  ;;  %v2253_v39 = vld [vmem:[%s2568_s26 + $0xd8] sm:$0xff] }
 0x2a3   : > { %1639 = vst [vmem:[%s3352_s8 + $0x30] sm:$0xff] %v1607_v58 }
 0x2a4   : > { %v1560_v17 = vpop.trf.xlu0 }
 0x2a5   : > { %v1608_v51 = vadd.f32 %v2233_v1, %v1560_v17  ;;  %v2254_v17 = vld [vmem:[%s2568_s26 + $0xe0] sm:$0xff] }
 0x2a7   : > { %1640 = vst [vmem:[%s3352_s8 + $0x38] sm:$0xff] %v1608_v51 }
 0x2a8   : > { %v1561_v14 = vpop.trf.xlu0 }
 0x2a9   : > { %v1609_v30 = vadd.f32 %v2234_v16, %v1561_v14  ;;  %v2255_v14 = vld [vmem:[%s2568_s26 + $0xe8] sm:$0xff] }
 0x2ab   : > { %1641 = vst [vmem:[%s3352_s8 + $0x40] sm:$0xff] %v1609_v30 }
 0x2ac   : > { %v1562_v15 = vpop.trf.xlu0 }
 0x2ad   : > { %v1610_v63 = vadd.f32 %v2235_v21, %v1562_v15  ;;  %v2256_v15 = vld [vmem:[%s2568_s26 + $0xf0] sm:$0xff] }
 0x2af   : > { %1642 = vst [vmem:[%s3352_s8 + $0x48] sm:$0xff] %v1610_v63 }
 0x2b0   : > { %v1563_v11 = vpop.trf.xlu0 }
 0x2b1   : > { %v1611_v48 = vadd.f32 %v2236_v37, %v1563_v11  ;;  %v2257_v11 = vld [vmem:[%s2568_s26 + $0xf8] sm:$0xff] }
 0x2b3   : > { %1643 = vst [vmem:[%s3352_s8 + $0x50] sm:$0xff] %v1611_v48 }
 0x2b4   : > { %v1564_v62 = vpop.trf.xlu0 }
 0x2b5   : > { %v1612_v50 = vadd.f32 %v2237_v29, %v1564_v62 }
 0x2b7   : > { %1644 = vst [vmem:[%s3352_s8 + $0x58] sm:$0xff] %v1612_v50 }
 0x2b8   : > { %v1565_v36 = vpop.trf.xlu0 }
 0x2b9   : > { %v1613_v45 = vadd.f32 %v2238_v3, %v1565_v36 }
 0x2bb   : > { %1645 = vst [vmem:[%s3352_s8 + $0x60] sm:$0xff] %v1613_v45 }
 0x2bc   : > { %v1566_v33 = vpop.trf.xlu0 }
 0x2bd   : > { %v1614_v59 = vadd.f32 %v2239_v57, %v1566_v33 }
 0x2bf   : > { %1646 = vst [vmem:[%s3352_s8 + $0x68] sm:$0xff] %v1614_v59 }
 0x2c0   : > { %v1567_v56 = vpop.trf.xlu0 }
 0x2c1   : > { %v1615_v25 = vadd.f32 %v2240_v42, %v1567_v56 }
 0x2c3   : > { %1647 = vst [vmem:[%s3352_s8 + $0x70] sm:$0xff] %v1615_v25 }
 0x2c4   : > { %v1568_v28 = vpop.trf.xlu0 }
 0x2c5   : > { %v1616_v53 = vadd.f32 %v2241_v46, %v1568_v28 }
 0x2c7   : > { %1648 = vst [vmem:[%s3352_s8 + $0x78] sm:$0xff] %v1616_v53 }
 0x2c8   : > { %v1585_v12 = vpop.trf.xlu1 }
 0x2c9   : > { %v1617_v18 = vadd.f32 %v2242_v54, %v1585_v12 }
 0x2cb   : > { %1649 = vst [vmem:[%s3352_s8 + $0x80] sm:$0xff] %v1617_v18 }
 0x2cc   : > { %v1586_v0 = vpop.trf.xlu1 }
 0x2cd   : > { %v1618_v24 = vadd.f32 %v2243_v31, %v1586_v0 }
 0x2cf   : > { %1650 = vst [vmem:[%s3352_s8 + $0x88] sm:$0xff] %v1618_v24 }
 0x2d0   : > { %v1587_v22 = vpop.trf.xlu1 }
 0x2d1   : > { %v1619_v20 = vadd.f32 %v2244_v7, %v1587_v22 }
 0x2d3   : > { %1651 = vst [vmem:[%s3352_s8 + $0x90] sm:$0xff] %v1619_v20 }
 0x2d4   : > { %v1588_v44 = vpop.trf.xlu1 }
 0x2d5   : > { %v1620_v13 = vadd.f32 %v2245_v43, %v1588_v44 }
 0x2d7   : > { %1652 = vst [vmem:[%s3352_s8 + $0x98] sm:$0xff] %v1620_v13 }
 0x2d8   : > { %v1589_v40 = vpop.trf.xlu1 }
 0x2d9   : > { %v1621_v61 = vadd.f32 %v2246_v2, %v1589_v40 }
 0x2db   : > { %1653 = vst [vmem:[%s3352_s8 + $0xa0] sm:$0xff] %v1621_v61 }
 0x2dc   : > { %v1590_v27 = vpop.trf.xlu1 }
 0x2dd   : > { %v1622_v41 = vadd.f32 %v2247_v23, %v1590_v27 }
 0x2df   : > { %1654 = vst [vmem:[%s3352_s8 + $0xa8] sm:$0xff] %v1622_v41 }
 0x2e0   : > { %v1591_v60 = vpop.trf.xlu1 }
 0x2e1   : > { %v1623_v38 = vadd.f32 %v2248_v26, %v1591_v60 }
 0x2e3   : > { %1655 = vst [vmem:[%s3352_s8 + $0xb0] sm:$0xff] %v1623_v38 }
 0x2e4   : > { %v1592_v52 = vpop.trf.xlu1 }
 0x2e5   : > { %v1624_v19 = vadd.f32 %v2249_v8, %v1592_v52 }
 0x2e7   : > { %1656 = vst [vmem:[%s3352_s8 + $0xb8] sm:$0xff] %v1624_v19 }
 0x2e8   : > { %v1593_v49 = vpop.trf.xlu1 }
 0x2e9   : > { %v1625_v35 = vadd.f32 %v2250_v10, %v1593_v49 }
 0x2eb   : > { %1657 = vst [vmem:[%s3352_s8 + $0xc0] sm:$0xff] %v1625_v35 }
 0x2ec   : > { %v1594_v5 = vpop.trf.xlu1 }
 0x2ed   : > { %v1626_v9 = vadd.f32 %v2251_v32, %v1594_v5 }
 0x2ef   : > { %1658 = vst [vmem:[%s3352_s8 + $0xc8] sm:$0xff] %v1626_v9 }
 0x2f0   : > { %v1595_v6 = vpop.trf.xlu1 }
 0x2f1   : > { %v1627_v47 = vadd.f32 %v2252_v34, %v1595_v6 }
 0x2f3   : > { %1659 = vst [vmem:[%s3352_s8 + $0xd0] sm:$0xff] %v1627_v47 }
 0x2f4   : > { %v1596_v4 = vpop.trf.xlu1 }
 0x2f5   : > { %v1628_v55 = vadd.f32 %v2253_v39, %v1596_v4 }
 0x2f7   : > { %1660 = vst [vmem:[%s3352_s8 + $0xd8] sm:$0xff] %v1628_v55 }
 0x2f8   : > { %v1597_v58 = vpop.trf.xlu1 }
 0x2f9   : > { %v1629_v1 = vadd.f32 %v2254_v17, %v1597_v58 }
 0x2fb   : > { %1661 = vst [vmem:[%s3352_s8 + $0xe0] sm:$0xff] %v1629_v1 }
 0x2fc   : > { %v1598_v51 = vpop.trf.xlu1 }
 0x2fd   : > { %v1630_v16 = vadd.f32 %v2255_v14, %v1598_v51 }
 0x2ff   : > { %1662 = vst [vmem:[%s3352_s8 + $0xe8] sm:$0xff] %v1630_v16 }
 0x300   : > { %v1599_v30 = vpop.trf.xlu1 }
 0x301   : > { %v1631_v21 = vadd.f32 %v2256_v15, %v1599_v30 }
 0x303   : > { %1663 = vst [vmem:[%s3352_s8 + $0xf0] sm:$0xff] %v1631_v21 }
 0x304   : > { %v1600_v63 = vpop.trf.xlu1 }
 0x305   : > { %v1632_v37 = vadd.f32 %v2257_v11, %v1600_v63 }
 0x307   : > { %1664 = vst [vmem:[%s3352_s8 + $0xf8] sm:$0xff] %v1632_v37 }
 0x308   : > { %2329 = shalt.err (!%p2326_p7)
}
 0x309   : > { %s2330_s30 = scalar_lea.hbm %s3420_s11, 4096  ;;  %s2334_s10 = scalar_lea.hbm %s3471_s3, 8192 }
 0x30a   : > { %p2331_p9 = scmp.ne.s32.totalorder %s3420_s11, %s2330_s30  ;;  %p2335_p5 = scmp.lt.u32.totalorder %s3420_s11, %s3471_s3 }
 0x30b   : > { %p2336_p11 = scmp.lt.u32.totalorder %s2334_s10, %s2330_s30  ;;  %p2338_p4 = scmp.lt.u32.totalorder %s2330_s30, %s3420_s11 }
 0x30c   : > { %p2332_p1 = pnand %p2331_p9, %p2511_p12 }
 0x30d   : > { %p2337_p2 = por %p2336_p11, %p2335_p5 }
 0x30e   : > { %p2333_p0 = pneg %p2332_p1 }
 0x30f   : > { %p2339_p6 = por %p2338_p4, %p2337_p2 }
 0x311   : > { %p2340_p8 = pnand %p2339_p6, %p2333_p0 }
 0x313   : > { %2343 = shalt.err (!%p2340_p8)
}
 0x314   : > { %s2395_s20 = smov 128   ;;  %s2396_s8 = smov 8  }
 0x315   : > { %1969 = dma.vmem_to_hbm [thread:$0]  (%p2511_p12), %s3422_s4, 4096, %s3420_s11, %s1666_s27, %s2395_s20, %s2395_s20, %s2396_s8  }
 0x316 PF: > { %s1695_s9 = sand.u32 1, %s2374_s12   ;;  %p3568_p10 = scmp.ne.s32.totalorder %s3498_s19, 0 }
 0x317   : > { %p3569_p13 = scmp.ge.s32.totalorder %s2386_s15, 2  ;;  %s1696_s25 = scalar_lea.sflag [#allocation4], %s1695_s9 }
 0x319   : > { %p1980_p3 = pnand %p3569_p13, %p3568_p10 }
 0x31b   : > { %2369 = dma.done.wait (!%p1980_p3), %s1696_s25, 4096  }
 0x31c   : > { %2371 = vsyncadd (!%p1980_p3), %s1696_s25, 4294963200  ;;  %p17_p7 = scmp.ge.s32.totalorder %s2473_s24, 4   ;;  %s3570_s12 = smov %s2378_s13 }
 0x31d   : > { %s3571_s13 = smov %s2382_s14  ;;  %s3572_s14 = smov %s2507_s17 }
 0x31e   : > { %s3573_s15 = smov %s2473_s24  ;;  %19 = sbr.rel (!%p17_p7) target bundleno = 6 (0x6), region = 81 }
 0x325   :  { %1701 = vsyncpa [#allocation3], 1 }
 0x326   :  { %1703 = vsyncpa [#allocation3 + $0x1], 1 }
 0x327   :  { %1704 = vsyncpa [#allocation6], 1 }
 0x328   :  { %1705 = vsyncpa [#allocation4], 1 }
 0x329   :  { %1707 = vsyncpa [#allocation4 + $0x1], 1 }

</bundles_post_ra>
